<compile_context>
chip_gen: v6e
topology: v6e:2x2x1
jax: 0.10.0
libtpu: 0.0.40
codegen_flags: <defaults>
</compile_context>

<pallas_src>
import string

import numpy as np

import jax
import jax.numpy as jnp
from jax.experimental import pallas as pl
from jax.experimental.pallas import tpu as pltpu

seq_length = 32
vocab = " " + string.ascii_lowercase
vocab_size = len(vocab)            # 27
D = seq_length * vocab_size        # 864   (flattened in/out features)
D_PAD = 1024                       # 8*128: lane-dense output, 128-multiple N tiles


def _num_weight_tiles() -> int:
    """2 N-tiles only on chips with 2 TensorCores (v7x / v5p / v4); else 1.

    On single-TC chips (v5e/v6e) a second grid step only adds per-step overhead on
    a ~2-3 us weight-DMA-bound kernel, so we keep grid=(1,).
    """
    try:
        kind = jax.devices()[0].device_kind.lower()
    except Exception:
        return 1
    if any(tag in kind for tag in ("v7", "7x", "v5p", "v4")):
        return 2
    return 1


NUM_TILES = _num_weight_tiles()
TILE_N = D_PAD // NUM_TILES        # 1024 (1 TC) or 512 (2 TCs)


def linear_kernel(x_ref, w_ref, s_ref, b_ref, o_ref):
    """One N-tile of y = x @ dequant(Wq) + b.

    x_ref: (B, D)       f32   -> cast to bf16 in-body
    w_ref: (D, TILE_N)  int8  (leading tile dim squeezed by BlockSpec)
    s_ref: (1, TILE_N)  f32   per-output-column dequant scale
    b_ref: (1, TILE_N)  f32   bias
    o_ref: (B, TILE_N)  f32
    """
    x = x_ref[...].astype(jnp.bfloat16)
    # int8 -> f32 -> bf16; values |q| <= 127 are exactly representable in bf16,
    # so the only weight error is the offline int8 quantization itself.
    w = w_ref[...].astype(jnp.float32).astype(jnp.bfloat16)
    acc = jnp.dot(x, w, preferred_element_type=jnp.float32)
    o_ref[...] = (acc * s_ref[...] + b_ref[...]).astype(o_ref.dtype)


def prepare_params(w_torch_layout, bias):
    """One-time parameter prep (outside the hot path).

    w_torch_layout: (out, in) float32  -- PyTorch nn.Linear weight layout
    bias:           (out,)    float32
    Returns:
      w_q:     (NUM_TILES, D, TILE_N) int8   tile-contiguous, column-padded
      w_scale: (1, D_PAD)             float32 per-output-column dequant scale
      b_pad:   (1, D_PAD)             float32 zero-padded bias
    """
    w_in_out = jnp.transpose(w_torch_layout).astype(jnp.float32)          # (in, out)
    w_pad = jnp.zeros((D, D_PAD), jnp.float32).at[:, :D].set(w_in_out)

    # Symmetric per-output-column int8 quantization.
    absmax = jnp.max(jnp.abs(w_pad), axis=0, keepdims=True)               # (1, D_PAD)
    w_scale = jnp.where(absmax > 0.0, absmax / 127.0, 1.0).astype(jnp.float32)
    w_q2d = jnp.clip(jnp.round(w_pad / w_scale), -127.0, 127.0).astype(jnp.int8)

    # Tile-contiguous layout: each grid step's weight DMA is one contiguous block.
    w_q = jnp.transpose(w_q2d.reshape(D, NUM_TILES, TILE_N), (1, 0, 2))   # (nt, D, TILE_N)

    b_pad = jnp.zeros((1, D_PAD), jnp.float32).at[:, :D].set(bias)
    return w_q, w_scale, b_pad


@jax.jit
def ascii_model_forward(x, w_q, w_scale, b_pad):
    """x: (B, S, V) f32; w_q: (NUM_TILES, D, TILE_N) int8; scales/bias: (1, D_PAD) f32."""
    B = x.shape[0]
    x2 = x.reshape(B, D)    # stays f32; the kernel casts to bf16 in-body

    y = pl.pallas_call(
        linear_kernel,
        out_shape=jax.ShapeDtypeStruct((B, D_PAD), jnp.float32),
        grid=(NUM_TILES,),
        in_specs=[
            pl.BlockSpec((B, D), lambda j: (0, 0)),                       # activations
            pl.BlockSpec((pl.Squeezed(), D, TILE_N), lambda j: (j, 0, 0)),  # int8 W tile
            pl.BlockSpec((1, TILE_N), lambda j: (0, j)),                  # dequant scale
            pl.BlockSpec((1, TILE_N), lambda j: (0, j)),                  # bias
        ],
        out_specs=pl.BlockSpec((B, TILE_N), lambda j: (0, j)),
        compiler_params=pltpu.CompilerParams(
            dimension_semantics=("parallel",),   # N tiles independent -> 2-TC split on v7x
        ),
        cost_estimate=pl.CostEstimate(
            flops=2 * B * D * D_PAD,
            transcendentals=0,
            bytes_accessed=D * D_PAD            # int8 weights (critical path)
            + B * D * 4                          # f32 activations
            + B * D_PAD * 4                      # f32 output
            + 2 * D_PAD * 4,                     # scale + bias
        ),
    )(x2, w_q, w_scale, b_pad)

    # Drop the padded columns and restore (B, S, V).
    return y[:, :D].reshape(B, seq_length, vocab_size)


if __name__ == "__main__":
    key = jax.random.PRNGKey(0)
    k_x, k_w, k_b = jax.random.split(key, 3)

    batch = 2
    # Deterministic "parameters" in PyTorch layout: weight (out, in), bias (out,)
    w_torch_layout = jax.random.normal(k_w, (D, D), dtype=jnp.float32) * 0.02
    bias = jax.random.normal(k_b, (D,), dtype=jnp.float32) * 0.02
    # Input, shape (B, S, V)
    x = jax.random.normal(k_x, (batch, seq_length, vocab_size), dtype=jnp.float32)

    # One-time parameter preparation (transpose + pad + int8 quantize + tile layout).
    w_q, w_scale, b_pad = prepare_params(w_torch_layout, bias)

    logits = ascii_model_forward(x, w_q, w_scale, b_pad)
    logits = jax.block_until_ready(logits)
    assert logits.shape == (batch, seq_length, vocab_size)

    # ---------- Validation (float64 numpy references, no TPU matmul noise) ----------
    out64 = np.asarray(logits, dtype=np.float64)
    x64 = np.asarray(x, dtype=np.float64).reshape(batch, D)
    w64 = np.asarray(w_torch_layout, dtype=np.float64)
    b64 = np.asarray(bias, dtype=np.float64)

    # (a) Kernel-math fidelity vs. the int8-dequantized linear (errors: bf16
    #     activations + f32 MXU accumulation only).
    w_deq = (
        np.asarray(w_q, dtype=np.float64).transpose(1, 0, 2).reshape(D, D_PAD)
        * np.asarray(w_scale, dtype=np.float64)
    )[:, :D]
    ref_q = (x64 @ w_deq + b64).reshape(batch, seq_length, vocab_size)
    err_q = float(np.max(np.abs(out64 - ref_q)))
    assert np.allclose(out64, ref_q, atol=1e-2, rtol=1e-2), err_q

    # (b) End-to-end vs. the f32 PyTorch-equivalent reference; includes the int8
    #     weight-quantization error, validated against the 3e-2 tolerance
    #     (per-column quant noise ~ sqrt(K)*absmax/(127*sqrt(12)) ~ 5e-3 std).
    ref = (x64 @ w64.T + b64).reshape(batch, seq_length, vocab_size)
    err = float(np.max(np.abs(out64 - ref)))
    assert np.allclose(out64, ref, atol=3e-2, rtol=3e-2), err

    print("KERNEL_OK")
</pallas_src>

<mosaic_0001>
module attributes {stable_mosaic.version = 11 : i64} {
  func.func @linear_kernel(%arg0: i32, %arg1: memref<2x864xf32, #tpu.memory_space<vmem>>, %arg2: memref<1x864x1024xi8, #tpu.memory_space<vmem>>, %arg3: memref<1x1024xf32, #tpu.memory_space<vmem>>, %arg4: memref<1x1024xf32, #tpu.memory_space<vmem>>, %arg5: memref<2x1024xf32, #tpu.memory_space<vmem>>) attributes {dimension_semantics = [#tpu.dimension_semantics<parallel>], iteration_bounds = array<i64: 1>, scalar_prefetch = 0 : i64, scratch_operands = 0 : i64, tpu.core_type = #tpu.core_type<tc>, window_params = [{pipeline_mode = #tpu.pipeline_mode<synchronous>, transform_indices = @transform_0, window_bounds = array<i64: 2, 864>}, {transform_indices = @transform_1, window_bounds = array<i64: 1, 864, 1024>}, {transform_indices = @transform_2, window_bounds = array<i64: 1, 1024>}, {transform_indices = @transform_3, window_bounds = array<i64: 1, 1024>}, {transform_indices = @transform_4, window_bounds = array<i64: 2, 1024>}]} {
    %c0 = arith.constant 0 : index
    %c0_0 = arith.constant 0 : index
    %0 = vector.load %arg1[%c0, %c0_0] : memref<2x864xf32, #tpu.memory_space<vmem>>, vector<2x864xf32>
    %1 = arith.truncf %0 : vector<2x864xf32> to vector<2x864xbf16>
    %c0_1 = arith.constant 0 : index
    %c0_2 = arith.constant 0 : index
    %c0_3 = arith.constant 0 : index
    %2 = vector.load %arg2[%c0_1, %c0_2, %c0_3] : memref<1x864x1024xi8, #tpu.memory_space<vmem>>, vector<1x864x1024xi8>
    %3 = vector.shape_cast %2 : vector<1x864x1024xi8> to vector<864x1024xi8>
    %4 = arith.sitofp %3 : vector<864x1024xi8> to vector<864x1024xf32>
    %5 = arith.truncf %4 : vector<864x1024xf32> to vector<864x1024xbf16>
    %cst = arith.constant dense<0.000000e+00> : vector<2x1024xf32>
    %6 = tpu.matmul %1, %5, %cst {dimension_numbers = #tpu.dot_dimension_numbers<[1], [0], [0], [1], [0, 0, 1, 1], [], []>} : vector<2x864xbf16>, vector<864x1024xbf16>, vector<2x1024xf32> -> vector<2x1024xf32>
    %c0_4 = arith.constant 0 : index
    %c0_5 = arith.constant 0 : index
    %7 = vector.load %arg3[%c0_4, %c0_5] : memref<1x1024xf32, #tpu.memory_space<vmem>>, vector<1x1024xf32>
    %8 = vector.broadcast %7 : vector<1x1024xf32> to vector<2x1024xf32>
    %9 = arith.mulf %6, %8 : vector<2x1024xf32>
    %c0_6 = arith.constant 0 : index
    %c0_7 = arith.constant 0 : index
    %10 = vector.load %arg4[%c0_6, %c0_7] : memref<1x1024xf32, #tpu.memory_space<vmem>>, vector<1x1024xf32>
    %11 = vector.broadcast %10 : vector<1x1024xf32> to vector<2x1024xf32>
    %12 = arith.addf %9, %11 : vector<2x1024xf32>
    %c0_8 = arith.constant 0 : index
    %c0_9 = arith.constant 0 : index
    %13 = vector.load %arg5[%c0_8, %c0_9] : memref<2x1024xf32, #tpu.memory_space<vmem>>, vector<2x1024xf32>
    tpu.vector_store %arg5[%c0_8, %c0_9], %12 {strides = array<i32>} : memref<2x1024xf32, #tpu.memory_space<vmem>>, vector<2x1024xf32>,
    return
  }
  func.func @transform_0(%arg0: i32) -> (i32, i32) {
    %c0_i32 = arith.constant 0 : i32
    %c0_i32_0 = arith.constant 0 : i32
    %c0_i32_1 = arith.constant 0 : i32
    return %c0_i32, %c0_i32_0 : i32, i32
  }
  func.func @transform_1(%arg0: i32) -> (i32, i32, i32) {
    %c0_i32 = arith.constant 0 : i32
    %c0_i32_0 = arith.constant 0 : i32
    %c0_i32_1 = arith.constant 0 : i32
    return %arg0, %c0_i32, %c0_i32_0 : i32, i32, i32
  }
  func.func @transform_2(%arg0: i32) -> (i32, i32) {
    %c0_i32 = arith.constant 0 : i32
    %c0_i32_0 = arith.constant 0 : i32
    return %c0_i32, %arg0 : i32, i32
  }
  func.func @transform_3(%arg0: i32) -> (i32, i32) {
    %c0_i32 = arith.constant 0 : i32
    %c0_i32_0 = arith.constant 0 : i32
    return %c0_i32, %arg0 : i32, i32
  }
  func.func @transform_4(%arg0: i32) -> (i32, i32) {
    %c0_i32 = arith.constant 0 : i32
    %c0_i32_0 = arith.constant 0 : i32
    return %c0_i32, %arg0 : i32, i32
  }
}

</mosaic_0001>

<bundles_post_ra>
// kernel: ascii_model_forward.1
= control target key start
LH: loop header
LB: loop body
LE: loop exit
PB: predicated region body
PF: predicated region fallthrough
CT: control target
= control target key end

     0   :  { %9 = vsyncpa [#allocation3], 0  ;;  %s1575_s15 = smov [#allocation2]   ;;  %s1773_s0 = inlined_call_operand.vmem [shape: f32[2,864], index: 0, kind: input, shape index: {}]   ;;  %s1774_s1 = inlined_call_operand.hbm [shape: s8[1,864,1024], index: 1, kind: input, shape index: {}]   ;;  %s1775_s2 = inlined_call_operand.vmem [shape: f32[1,1024], index: 2, kind: input, shape index: {}]   ;;  %s1776_s3 = inlined_call_operand.vmem [shape: f32[1,1024], index: 3, kind: input, shape index: {}]   ;;  %s1777_s4 = inlined_call_operand.vmem [shape: f32[2,1024], index: 4, kind: output, shape index: {}]  }
   0x1   :  { %s17_s16 = sshll.u32 %s1575_s15, 4  ;;  %s18_s16 = int_to_ptr.vmem [resolvable:$true] %s17_s16 }
   0x2   :  { %s1561_s17 = scalar_lea.vmem %s18_s16, 27648  ;;  %p1566_p1 = scmp.lt.s32.totalorder %s18_s16, %s18_s16 }
   0x3   :  { %p1562_p0 = scmp.ne.s32.totalorder %s18_s16, %s1561_s17  ;;  %p1567_p2 = scmp.lt.s32.totalorder %s1561_s17, %s1561_s17 }
   0x5   :  { %p1568_p3 = por %p1567_p2, %p1566_p1 }
   0x7   :  { %p1569_p4 = pnand %p1568_p3, %p1562_p0 }
   0x9   :  { %1572 = shalt.err (!%p1569_p4)
}
   0xa   :  { %s1576_s18 = smov 1024   ;;  %s1577_s19 = smov 64  }
   0xb   :  { %23 = dma.hbm_to_vmem [thread:$0]  %s1774_s1, 27648, %s18_s16, [#allocation3], %s1576_s18, %s1576_s18, %s1577_s19  }
   0xc   :  { %1573 = dma.done.wait [#allocation3], 27648  }
   0xd   :  { %1574 = vsyncadd [#allocation3], 4294939648  ;;  %v108_v0 = vld [vmem:[#allocation2 + $0xc8] sm:$0xff]  ;;  %v107_v2 = vld [vmem:[#allocation2 + $0xc0] sm:$0xff]  ;;  %v1578_v18 = vmov 1983009808   ;;  %v40_v20 = vlaneseq }
   0xe   :  { %v172_v1 = vld [vmem:[#allocation2 + $0x2c8] sm:$0xff]  ;;  %v348_v3 = vunpack.c.l.s8.bf16 %v108_v0  ;;  %v356_v4 = vunpack.c.h.s8.bf16 %v108_v0  ;;  %v171_v7 = vld [vmem:[#allocation2 + $0x2c0] sm:$0xff]  ;;  %v355_v8 = vunpack.c.h.s8.bf16 %v107_v2  ;;  %v347_v12 = vunpack.c.l.s8.bf16 %v107_v2 }
   0xf   :  { %v476_v5 = vunpack.c.l.s8.bf16 %v172_v1  ;;  %v484_v6 = vunpack.c.h.s8.bf16 %v172_v1  ;;  %v483_v9 = vunpack.c.h.s8.bf16 %v171_v7  ;;  %v100_v10 = vld [vmem:[#allocation2 + $0x88] sm:$0xff]  ;;  %v475_v13 = vunpack.c.l.s8.bf16 %v171_v7  ;;  %v99_v16 = vld [vmem:[#allocation2 + $0x80] sm:$0xff] }
  0x10   :  { %v164_v11 = vld [vmem:[#allocation2 + $0x288] sm:$0xff]  ;;  %735 = vmatprep.subr.bf16.mxu0 %v356_v4  ;;  %v340_v14 = vunpack.c.h.s8.bf16 %v100_v10  ;;  %v163_v17 = vld [vmem:[#allocation2 + $0x280] sm:$0xff]  ;;  %v38_v19 = vunpack.c.l.s4 %v1578_v18  ;;  %v339_v21 = vunpack.c.h.s8.bf16 %v99_v16  ;;  %v332_v23 = vunpack.c.l.s8.bf16 %v100_v10 }
  0x11   :  { %776 = vmatprep.subr.bf16.mxu1 %v484_v6  ;;  %736 = vmatpush1.bf16.msra.mxu0 %v355_v8  ;;  %v468_v15 = vunpack.c.h.s8.bf16 %v164_v11  ;;  %v467_v22 = vunpack.c.h.s8.bf16 %v163_v17  ;;  %v460_v24 = vunpack.c.l.s8.bf16 %v164_v11  ;;  %v1608_v26 = vshrl.u32 %v40_v20, 7  ;;  %v92_v27 = vld [vmem:[#allocation2 + $0x48] sm:$0xff]  ;;  %v91_v33 = vld [vmem:[#allocation2 + $0x40] sm:$0xff] }
  0x12   :  { %777 = vmatpush1.bf16.msra.mxu1 %v483_v9  ;;  %737 = vmatprep.subr.bf16.mxu0 %v348_v3  ;;  %v39_v25 = vunpack.c.0.s8 %v38_v19  ;;  %v156_v28 = vld [vmem:[#allocation2 + $0x248] sm:$0xff]  ;;  %v331_v29 = vunpack.c.l.s8.bf16 %v99_v16  ;;  %v459_v30 = vunpack.c.l.s8.bf16 %v163_v17  ;;  %v324_v31 = vunpack.c.h.s8.bf16 %v92_v27  ;;  %v155_v34 = vld [vmem:[#allocation2 + $0x240] sm:$0xff] }
  0x13   :  { %778 = vmatprep.subr.bf16.mxu1 %v476_v5  ;;  %v452_v32 = vunpack.c.h.s8.bf16 %v156_v28  ;;  %v32_v36 = vld [vmem:[%s1773_s0] sm:$0xff]  ;;  %v323_v37 = vunpack.c.h.s8.bf16 %v91_v33  ;;  %v451_v38 = vunpack.c.h.s8.bf16 %v155_v34  ;;  %v316_v39 = vunpack.c.l.s8.bf16 %v92_v27  ;;  %v84_v43 = vld [vmem:[#allocation2 + $0x8] sm:$0xff] }
  0x14   :  { %v1611_v35 = vsub.s32 %v39_v25, %v1608_v26  ;;  %v444_v40 = vunpack.c.l.s8.bf16 %v156_v28  ;;  %v36_v42 = vcombine.high %v32_v36, %v32_v36  ;;  %v148_v44 = vld [vmem:[#allocation2 + $0x208] sm:$0xff]  ;;  %v315_v47 = vunpack.c.l.s8.bf16 %v91_v33  ;;  %v83_v51 = vld [vmem:[#allocation2] sm:$0xff] }
  0x15   :  { %738 = vmatpush1.bf16.msra.mxu0 %v347_v12  ;;  %v443_v48 = vunpack.c.l.s8.bf16 %v155_v34  ;;  %v308_v49 = vunpack.c.h.s8.bf16 %v84_v43  ;;  %v436_v50 = vunpack.c.h.s8.bf16 %v148_v44  ;;  %v147_v52 = vld [vmem:[#allocation2 + $0x200] sm:$0xff]  ;;  %v307_v56 = vunpack.c.h.s8.bf16 %v83_v51  ;;  %v140_v60 = vld [vmem:[#allocation2 + $0x1c8] sm:$0xff] }
  0x16   :  { %779 = vmatpush1.bf16.msra.mxu1 %v475_v13  ;;  %739 = vmatprep.subr.bf16.mxu0 %v340_v14  ;;  %v1617_v41 = vrot.slane %v32_v36, %v1611_v35  ;;  %v1622_v46 = vrot.slane %v36_v42, %v1611_v35  ;;  %v435_v57 = vunpack.c.h.s8.bf16 %v147_v52  ;;  %v300_v58 = vunpack.c.l.s8.bf16 %v84_v43  ;;  %v204_v61 = vld [vmem:[#allocation2 + $0x3c8] sm:$0xff]  ;;  %v139_v2 = vld [vmem:[#allocation2 + $0x1c0] sm:$0xff] }
  0x17   :  { %780 = vmatprep.subr.bf16.mxu1 %v468_v15  ;;  %v428_v59 = vunpack.c.l.s8.bf16 %v148_v44  ;;  %v299_v62 = vunpack.c.l.s8.bf16 %v83_v51  ;;  %v427_v63 = vunpack.c.l.s8.bf16 %v147_v52  ;;  %v420_v0 = vunpack.c.h.s8.bf16 %v140_v60  ;;  %v203_v3 = vld [vmem:[#allocation2 + $0x3c0] sm:$0xff]  ;;  %v132_v8 = vld [vmem:[#allocation2 + $0x188] sm:$0xff] }
  0x18   :  { %v51_v45 = vcombine.high %v1617_v41, %v1617_v41  ;;  %v52_v54 = vcombine.high %v1622_v46, %v1622_v46  ;;  %v548_v1 = vunpack.c.h.s8.bf16 %v204_v61  ;;  %v419_v4 = vunpack.c.h.s8.bf16 %v139_v2  ;;  %v196_v9 = vld [vmem:[#allocation2 + $0x388] sm:$0xff]  ;;  %v131_v14 = vld [vmem:[#allocation2 + $0x180] sm:$0xff] }
  0x19   :  { %740 = vmatpush1.bf16.msra.mxu0 %v339_v21  ;;  %v547_v5 = vunpack.c.h.s8.bf16 %v203_v3  ;;  %v412_v6 = vunpack.c.l.s8.bf16 %v140_v60  ;;  %v540_v7 = vunpack.c.l.s8.bf16 %v204_v61  ;;  %v411_v10 = vunpack.c.l.s8.bf16 %v139_v2  ;;  %v195_v15 = vld [vmem:[#allocation2 + $0x380] sm:$0xff]  ;;  %v124_v20 = vld [vmem:[#allocation2 + $0x148] sm:$0xff] }
  0x1a   :  { %781 = vmatpush1.bf16.msra.mxu1 %v467_v22  ;;  %741 = vmatprep.subr.bf16.mxu0 %v332_v23  ;;  %v1624_v53 = vpack.c.bf16 %v51_v45, %v51_v45  ;;  %v1629_v55 = vpack.c.bf16 %v52_v54, %v52_v54  ;;  %v539_v11 = vunpack.c.l.s8.bf16 %v203_v3  ;;  %v404_v12 = vunpack.c.h.s8.bf16 %v132_v8  ;;  %v188_v21 = vld [vmem:[#allocation2 + $0x348] sm:$0xff]  ;;  %v123_v27 = vld [vmem:[#allocation2 + $0x140] sm:$0xff] }
  0x1b   :  { %782 = vmatprep.subr.bf16.mxu1 %v460_v24  ;;  %v532_v13 = vunpack.c.h.s8.bf16 %v196_v9  ;;  %v403_v16 = vunpack.c.h.s8.bf16 %v131_v14  ;;  %v531_v17 = vunpack.c.h.s8.bf16 %v195_v15  ;;  %v396_v18 = vunpack.c.l.s8.bf16 %v132_v8  ;;  %v187_v28 = vld [vmem:[#allocation2 + $0x340] sm:$0xff]  ;;  %v116_v33 = vld [vmem:[#allocation2 + $0x108] sm:$0xff] }
  0x1c   :  { %767 = vmatprep.mubr.bf16.mxu0 %v1624_v53  ;;  %808 = vmatprep.mubr.bf16.mxu1 %v1629_v55  ;;  %v524_v19 = vunpack.c.l.s8.bf16 %v196_v9  ;;  %v395_v22 = vunpack.c.l.s8.bf16 %v131_v14  ;;  %v523_v23 = vunpack.c.l.s8.bf16 %v195_v15  ;;  %v388_v24 = vunpack.c.h.s8.bf16 %v124_v20  ;;  %v180_v34 = vld [vmem:[#allocation2 + $0x308] sm:$0xff]  ;;  %v179_v42 = vld [vmem:[#allocation2 + $0x300] sm:$0xff] }
  0x1d   :  { %742 = vmatpush1.bf16.msra.mxu0 %v331_v29  ;;  %v516_v25 = vunpack.c.h.s8.bf16 %v188_v21  ;;  %v387_v29 = vunpack.c.h.s8.bf16 %v123_v27  ;;  %v379_v36 = vunpack.c.l.s8.bf16 %v123_v27  ;;  %v499_v44 = vunpack.c.h.s8.bf16 %v179_v42  ;;  %v228_v3 = vld [vmem:[#allocation2 + $0x488] sm:$0xff]  ;;  %v227_v8 = vld [vmem:[#allocation2 + $0x480] sm:$0xff] }
  0x1e   :  { %783 = vmatpush1.bf16.msra.mxu1 %v459_v30  ;;  %743 = vmatprep.subr.bf16.mxu0 %v324_v31  ;;  %v515_v30 = vunpack.c.h.s8.bf16 %v187_v28  ;;  %v380_v31 = vunpack.c.l.s8.bf16 %v124_v20  ;;  %v364_v45 = vunpack.c.l.s8.bf16 %v116_v33  ;;  %v491_v54 = vunpack.c.l.s8.bf16 %v179_v42  ;;  %v283_v9 = vld [vmem:[#allocation2 + $0x640] sm:$0xff]  ;;  %v220_v15 = vld [vmem:[#allocation2 + $0x448] sm:$0xff] }
  0x1f   :  { %784 = vmatprep.subr.bf16.mxu1 %v452_v32  ;;  %v508_v32 = vunpack.c.l.s8.bf16 %v188_v21  ;;  %v1645_v61 = vpack.c.bf16 %v1617_v41, %v1617_v41  ;;  %v219_v21 = vld [vmem:[#allocation2 + $0x440] sm:$0xff]  ;;  %v572_v27 = vunpack.c.l.s8.bf16 %v220_v15  ;;  %vm731_vm0 = vcmask 785408  }
  0x21   :  { %744 = vmatpush1.bf16.msra.mxu0 %v323_v37  ;;  %v507_v37 = vunpack.c.l.s8.bf16 %v187_v28 }
  0x22   :  { %785 = vmatpush1.bf16.msra.mxu1 %v451_v38  ;;  %745 = vmatprep.subr.bf16.mxu0 %v316_v39  ;;  %v372_v38 = vunpack.c.h.s8.bf16 %v116_v33  ;;  %v500_v39 = vunpack.c.h.s8.bf16 %v180_v34 }
  0x23   :  { %786 = vmatprep.subr.bf16.mxu1 %v444_v40  ;;  %v115_v40 = vld [vmem:[#allocation2 + $0x100] sm:$0xff] }
  0x24   :  { %v371_v43 = vunpack.c.h.s8.bf16 %v115_v40  ;;  %v363_v52 = vunpack.c.l.s8.bf16 %v115_v40 }
  0x25   :  { %746 = vmatpush1.bf16.msra.mxu0 %v315_v47  ;;  %v492_v47 = vunpack.c.l.s8.bf16 %v180_v34 }
  0x26   :  { %787 = vmatpush1.bf16.msra.mxu1 %v443_v48  ;;  %747 = vmatprep.subr.bf16.mxu0 %v308_v49  ;;  %v1635_v48 = vld [vmem:[%s1773_s0 + $0x8] sm:$0x3f] }
  0x27   :  { %788 = vmatprep.subr.bf16.mxu1 %v436_v50  ;;  %v236_v49 = vld [vmem:[#allocation2 + $0x4c8] sm:$0xff]  ;;  %v1639_v51 = vrot.slane %v1635_v48, %v1611_v35 }
  0x28   :  { %v292_v50 = vld [vmem:[#allocation2 + $0x688] sm:$0xff] }
  0x29   :  { %748 = vmatpush1.bf16.msra.mxu0 %v307_v56  ;;  %v612_v56 = vunpack.c.h.s8.bf16 %v236_v49  ;;  %v68_v60 = vcombine.high %v1639_v51, %v1639_v51  ;;  %v716_v2 = vunpack.c.l.s8.bf16 %v292_v50 }
  0x2a   :  { %789 = vmatpush1.bf16.msra.mxu1 %v435_v57  ;;  %749 = vmatprep.subr.bf16.mxu0 %v300_v58  ;;  %v724_v57 = vunpack.c.h.s8.bf16 %v292_v50  ;;  %v235_v58 = vld [vmem:[#allocation2 + $0x4c0] sm:$0xff] }
  0x2b   :  { %790 = vmatprep.subr.bf16.mxu1 %v428_v59  ;;  %v291_v59 = vld [vmem:[#allocation2 + $0x680] sm:$0xff]  ;;  %v603_v41 = vunpack.c.l.s8.bf16 %v235_v58 }
  0x2d   :  { %750 = vmatpush1.bf16.msra.mxu0 %v299_v62  ;;  %v1649_v62 = vpack.c.bf16 %v1622_v46, %v1622_v46  ;;  %v715_v46 = vunpack.c.l.s8.bf16 %v291_v59 }
  0x2e   :  { %791 = vmatpush1.bf16.msra.mxu1 %v427_v63  ;;  %751 = vmatprep.subr.bf16.mxu0 %v420_v0  ;;  %v611_v63 = vunpack.c.h.s8.bf16 %v235_v58  ;;  %v723_v0 = vunpack.c.h.s8.bf16 %v291_v59 }
  0x2f   :  { %792 = vmatprep.subr.bf16.mxu1 %v548_v1  ;;  %v604_v1 = vunpack.c.l.s8.bf16 %v236_v49 }
  0x31   :  { %752 = vmatpush2.bf16.msra.mxu0 %v419_v4  ;;  %v284_v4 = vld [vmem:[#allocation2 + $0x648] sm:$0xff] }
  0x32   :  { %793 = vmatpush2.bf16.msra.mxu1 %v547_v5  ;;  %753 = vmatprep.subr.bf16.mxu0 %v412_v6  ;;  %v1651_v5 = vpack.c.bf16 %v68_v60, %v68_v60  ;;  %v596_v6 = vunpack.c.h.s8.bf16 %v228_v3  ;;  %v700_v14 = vunpack.c.l.s8.bf16 %v284_v4 }
  0x33   :  { %794 = vmatprep.subr.bf16.mxu1 %v540_v7  ;;  %v708_v7 = vunpack.c.h.s8.bf16 %v284_v4 }
  0x35   :  { %754 = vmatpush2.bf16.msra.mxu0 %v411_v10  ;;  %v1579_v10 = vmov 0  }
  0x36   :  { %795 = vmatpush2.bf16.msra.mxu1 %v539_v11  ;;  %755 = vmatprep.subr.bf16.mxu0 %v404_v12  ;;  %v595_v11 = vunpack.c.h.s8.bf16 %v227_v8  ;;  %v707_v12 = vunpack.c.h.s8.bf16 %v283_v9 }
  0x37   :  { %796 = vmatprep.subr.bf16.mxu1 %v532_v13  ;;  %v588_v13 = vunpack.c.l.s8.bf16 %v228_v3 }
  0x39   :  { %756 = vmatpush2.bf16.msra.mxu0 %v403_v16  ;;  %v276_v16 = vld [vmem:[#allocation2 + $0x608] sm:$0xff] }
  0x3a   :  { %797 = vmatpush2.bf16.msra.mxu1 %v531_v17  ;;  %757 = vmatprep.subr.bf16.mxu0 %v396_v18  ;;  %v587_v17 = vunpack.c.l.s8.bf16 %v227_v8  ;;  %v699_v18 = vunpack.c.l.s8.bf16 %v283_v9  ;;  %v692_v20 = vunpack.c.h.s8.bf16 %v276_v16  ;;  %v684_v28 = vunpack.c.l.s8.bf16 %v276_v16 }
  0x3b   :  { %798 = vmatprep.subr.bf16.mxu1 %v524_v19  ;;  %v580_v19 = vunpack.c.h.s8.bf16 %v220_v15 }
  0x3d   :  { %758 = vmatpush2.bf16.msra.mxu0 %v395_v22  ;;  %v275_v22 = vld [vmem:[#allocation2 + $0x600] sm:$0xff] }
  0x3e   :  { %799 = vmatpush2.bf16.msra.mxu1 %v523_v23  ;;  %759 = vmatprep.subr.bf16.mxu0 %v388_v24  ;;  %v53_v23 = vcombine.high %v1635_v48, %v1635_v48  ;;  %v579_v24 = vunpack.c.h.s8.bf16 %v219_v21  ;;  %v683_v33 = vunpack.c.l.s8.bf16 %v275_v22 }
  0x3f   :  { %800 = vmatprep.subr.bf16.mxu1 %v516_v25  ;;  %v691_v25 = vunpack.c.h.s8.bf16 %v275_v22 }
  0x41   :  { %760 = vmatpush2.bf16.msra.mxu0 %v387_v29  ;;  %v212_v29 = vld [vmem:[#allocation2 + $0x408] sm:$0xff] }
  0x42   :  { %801 = vmatpush2.bf16.msra.mxu1 %v515_v30  ;;  %761 = vmatprep.subr.bf16.mxu0 %v380_v31  ;;  %v110_v30 = vld [vmem:[#allocation2 + $0xd8] sm:$0xff]  ;;  %v67_v31 = vrot.slane %v53_v23, %v1611_v35  ;;  %v564_v34 = vunpack.c.h.s8.bf16 %v212_v29  ;;  %v244_v23 = vld [vmem:[#allocation2 + $0x508] sm:$0xff] }
  0x43   :  { %802 = vmatprep.subr.bf16.mxu1 %v508_v32  ;;  %v571_v32 = vunpack.c.l.s8.bf16 %v219_v21 }
  0x45   :  { %762 = vmatpush2.bf16.msra.mxu0 %v379_v36  ;;  %v358_v36 = vunpack.c.h.s8.bf16 %v110_v30 }
  0x46   :  { %803 = vmatpush2.bf16.msra.mxu1 %v507_v37  ;;  %763 = vmatprep.subr.bf16.mxu0 %v372_v38  ;;  %v211_v37 = vld [vmem:[#allocation2 + $0x400] sm:$0xff]  ;;  %v109_v38 = vld [vmem:[#allocation2 + $0xd0] sm:$0xff] }
  0x47   :  { %804 = vmatprep.subr.bf16.mxu1 %v500_v39  ;;  %v1660_v39 = vpack.c.bf16 %v67_v31, %v67_v31  ;;  %v563_v40 = vunpack.c.h.s8.bf16 %v211_v37  ;;  %v357_v42 = vunpack.c.h.s8.bf16 %v109_v38  ;;  %v555_v48 = vunpack.c.l.s8.bf16 %v211_v37  ;;  %v141_v31 = vld [vmem:[#allocation2 + $0x1d0] sm:$0xff]  ;;  %v134_v37 = vld [vmem:[#allocation2 + $0x198] sm:$0xff] }
  0x48   :  { %v349_v49 = vunpack.c.l.s8.bf16 %v109_v38  ;;  %v174_v38 = vld [vmem:[#allocation2 + $0x2d8] sm:$0xff] }
  0x49   :  { %764 = vmatpush2.bf16.msra.mxu0 %v371_v43  ;;  %v556_v43 = vunpack.c.l.s8.bf16 %v212_v29 }
  0x4a   :  { %805 = vmatpush2.bf16.msra.mxu1 %v499_v44  ;;  %765 = vmatprep.subr.bf16.mxu0 %v364_v45  ;;  %v350_v44 = vunpack.c.l.s8.bf16 %v110_v30  ;;  %v268_v45 = vld [vmem:[#allocation2 + $0x5c8] sm:$0xff]  ;;  %v243_v30 = vld [vmem:[#allocation2 + $0x500] sm:$0xff] }
  0x4b   :  { %806 = vmatprep.subr.bf16.mxu1 %v492_v47  ;;  %v102_v47 = vld [vmem:[#allocation2 + $0x98] sm:$0xff]  ;;  %v676_v50 = vunpack.c.h.s8.bf16 %v268_v45  ;;  %v668_v59 = vunpack.c.l.s8.bf16 %v268_v45  ;;  %v133_v45 = vld [vmem:[#allocation2 + $0x190] sm:$0xff] }
  0x4c   :  { %v334_v60 = vunpack.c.l.s8.bf16 %v102_v47 }
  0x4d   :  { %766 = vmatpush2.bf16.msra.mxu0 %v363_v52  ;;  %v342_v52 = vunpack.c.h.s8.bf16 %v102_v47  ;;  %v173_v47 = vld [vmem:[#allocation2 + $0x2d0] sm:$0xff] }
  0x4e   :  { %807 = vmatpush2.bf16.msra.mxu1 %v491_v54  ;;  %817 = vmatprep.subr.bf16.mxu0 %v612_v56  ;;  %v267_v54 = vld [vmem:[#allocation2 + $0x5c0] sm:$0xff]  ;;  %v101_v56 = vld [vmem:[#allocation2 + $0x90] sm:$0xff] }
  0x4f   :  { %862 = vmatprep.subr.bf16.mxu1 %v724_v57  ;;  %v675_v57 = vunpack.c.h.s8.bf16 %v267_v54  ;;  %v341_v58 = vunpack.c.h.s8.bf16 %v101_v56 }
  0x50   :  { %768 = vmatmul.mubr.bf16.vlgmr.msra.gmra.mxu0 %v1645_v61 }
  0x51   :  { %809 = vmatmul.mubr.bf16.vlgmr.msra.gmra.mxu1 %v1649_v62  ;;  %818 = vmatpush1.bf16.msra.mxu0 %v611_v63  ;;  %v260_v63 = vld [vmem:[#allocation2 + $0x588] sm:$0xff] }
  0x52   :  { %863 = vmatpush1.bf16.msra.mxu1 %v723_v0  ;;  %819 = vmatprep.subr.bf16.mxu0 %v604_v1  ;;  %v94_v0 = vld [vmem:[#allocation2 + $0x58] sm:$0xff]  ;;  %v667_v1 = vunpack.c.l.s8.bf16 %v267_v54  ;;  %v660_v3 = vunpack.c.h.s8.bf16 %v260_v63  ;;  %v652_v8 = vunpack.c.l.s8.bf16 %v260_v63  ;;  %v478_v54 = vunpack.c.l.s8.bf16 %v174_v38  ;;  %v125_v63 = vld [vmem:[#allocation2 + $0x150] sm:$0xff] }
  0x53   :  { %864 = vmatprep.subr.bf16.mxu1 %v716_v2  ;;  %890 = vmatprep.mubr.bf16.mxu1 %v1579_v10  ;;  %v333_v2 = vunpack.c.l.s8.bf16 %v101_v56  ;;  %v326_v4 = vunpack.c.h.s8.bf16 %v94_v0  ;;  %v318_v9 = vunpack.c.l.s8.bf16 %v94_v0  ;;  %v126_v56 = vld [vmem:[#allocation2 + $0x158] sm:$0xff]  ;;  %v165_v0 = vld [vmem:[#allocation2 + $0x290] sm:$0xff] }
  0x54   :  { %849 = vmatprep.mubr.bf16.mxu0 %v1651_v5 }
  0x55   :  { %820 = vmatpush1.bf16.msra.mxu0 %v603_v41  ;;  %v259_v41 = vld [vmem:[#allocation2 + $0x580] sm:$0xff] }
  0x56   :  { %865 = vmatpush1.bf16.msra.mxu1 %v715_v46  ;;  %821 = vmatprep.subr.bf16.mxu0 %v596_v6  ;;  %v93_v46 = vld [vmem:[#allocation2 + $0x50] sm:$0xff]  ;;  %v659_v6 = vunpack.c.h.s8.bf16 %v259_v41 }
  0x57   :  { %866 = vmatprep.subr.bf16.mxu1 %v708_v7  ;;  %v325_v7 = vunpack.c.h.s8.bf16 %v93_v46 }
  0x59   :  { %822 = vmatpush1.bf16.msra.mxu0 %v595_v11  ;;  %v252_v11 = vld [vmem:[#allocation2 + $0x548] sm:$0xff] }
  0x5a   :  { %867 = vmatpush1.bf16.msra.mxu1 %v707_v12  ;;  %823 = vmatprep.subr.bf16.mxu0 %v588_v13  ;;  %v86_v12 = vld [vmem:[#allocation2 + $0x18] sm:$0xff]  ;;  %v651_v13 = vunpack.c.l.s8.bf16 %v259_v41  ;;  %v644_v15 = vunpack.c.h.s8.bf16 %v252_v11  ;;  %v636_v21 = vunpack.c.l.s8.bf16 %v252_v11  ;;  %v117_v11 = vld [vmem:[#allocation2 + $0x110] sm:$0xff] }
  0x5b   :  { %868 = vmatprep.subr.bf16.mxu1 %v700_v14  ;;  %v317_v14 = vunpack.c.l.s8.bf16 %v93_v46  ;;  %v310_v16 = vunpack.c.h.s8.bf16 %v86_v12  ;;  %v302_v22 = vunpack.c.l.s8.bf16 %v86_v12  ;;  %v118_v41 = vld [vmem:[#allocation2 + $0x118] sm:$0xff]  ;;  %v157_v12 = vld [vmem:[#allocation2 + $0x250] sm:$0xff] }
  0x5c   :  { %v158_v46 = vld [vmem:[#allocation2 + $0x258] sm:$0xff] }
  0x5d   :  { %824 = vmatpush1.bf16.msra.mxu0 %v587_v17  ;;  %v251_v17 = vld [vmem:[#allocation2 + $0x540] sm:$0xff] }
  0x5e   :  { %869 = vmatpush1.bf16.msra.mxu1 %v699_v18  ;;  %825 = vmatprep.subr.bf16.mxu0 %v580_v19  ;;  %v85_v18 = vld [vmem:[#allocation2 + $0x10] sm:$0xff]  ;;  %v643_v19 = vunpack.c.h.s8.bf16 %v251_v17 }
  0x5f   :  { %870 = vmatprep.subr.bf16.mxu1 %v692_v20  ;;  %v309_v20 = vunpack.c.h.s8.bf16 %v85_v18 }
  0x61   :  { %826 = vmatpush1.bf16.msra.mxu0 %v579_v24  ;;  %v142_v24 = vld [vmem:[#allocation2 + $0x1d8] sm:$0xff] }
  0x62   :  { %871 = vmatpush1.bf16.msra.mxu1 %v691_v25  ;;  %827 = vmatprep.subr.bf16.mxu0 %v572_v27  ;;  %v635_v25 = vunpack.c.l.s8.bf16 %v251_v17  ;;  %v301_v27 = vunpack.c.l.s8.bf16 %v85_v18  ;;  %v422_v29 = vunpack.c.h.s8.bf16 %v142_v24  ;;  %v150_v17 = vld [vmem:[#allocation2 + $0x218] sm:$0xff] }
  0x63   :  { %872 = vmatprep.subr.bf16.mxu1 %v684_v28  ;;  %v628_v28 = vunpack.c.h.s8.bf16 %v244_v23  ;;  %v238_v18 = vld [vmem:[#allocation2 + $0x4d8] sm:$0xff] }
  0x65   :  { %828 = vmatpush1.bf16.msra.mxu0 %v571_v32  ;;  %v627_v32 = vunpack.c.h.s8.bf16 %v243_v30 }
  0x66   :  { %873 = vmatpush1.bf16.msra.mxu1 %v683_v33  ;;  %829 = vmatprep.subr.bf16.mxu0 %v564_v34  ;;  %v421_v33 = vunpack.c.h.s8.bf16 %v141_v31  ;;  %v620_v34 = vunpack.c.l.s8.bf16 %v244_v23  ;;  %v149_v23 = vld [vmem:[#allocation2 + $0x210] sm:$0xff] }
  0x67   :  { %899 = vmatprep.subr.bf16.mxu1 %v358_v36  ;;  %v414_v36 = vunpack.c.l.s8.bf16 %v142_v24  ;;  %v237_v24 = vld [vmem:[#allocation2 + $0x4d0] sm:$0xff] }
  0x69   :  { %1542 = vmatmul.mubr.msk.bf16.vlgmr.msra.gmra.mxu1 %vm731_vm0, %v1660_v39  ;;  %830 = vmatpush1.bf16.msra.mxu0 %v563_v40  ;;  %v619_v40 = vunpack.c.l.s8.bf16 %v243_v30  ;;  %v206_v30 = vld [vmem:[#allocation2 + $0x3d8] sm:$0xff] }
  0x6a   :  { %900 = vmatpush1.bf16.msra.mxu1 %v357_v42  ;;  %831 = vmatprep.subr.bf16.mxu0 %v556_v43  ;;  %v413_v42 = vunpack.c.l.s8.bf16 %v141_v31  ;;  %v406_v43 = vunpack.c.h.s8.bf16 %v134_v37  ;;  %v230_v31 = vld [vmem:[#allocation2 + $0x498] sm:$0xff] }
  0x6b   :  { %901 = vmatprep.subr.bf16.mxu1 %v350_v44  ;;  %931 = vmatprep.mubr.bf16.mxu1 %v1624_v53  ;;  %v486_v44 = vunpack.c.h.s8.bf16 %v174_v38  ;;  %v229_v38 = vld [vmem:[#allocation2 + $0x490] sm:$0xff] }
  0x6d   :  { %832 = vmatpush1.bf16.msra.mxu0 %v555_v48  ;;  %v1667_v48 = vpack.c.bf16 %v1639_v51, %v1639_v51  ;;  %v390_v51 = vunpack.c.h.s8.bf16 %v126_v56 }
  0x6e   :  { %902 = vmatpush1.bf16.msra.mxu1 %v349_v49  ;;  %833 = vmatprep.subr.bf16.mxu0 %v676_v50  ;;  %v405_v49 = vunpack.c.h.s8.bf16 %v133_v45  ;;  %v485_v50 = vunpack.c.h.s8.bf16 %v173_v47 }
  0x6f   :  { %903 = vmatprep.subr.bf16.mxu1 %v342_v52  ;;  %v398_v52 = vunpack.c.l.s8.bf16 %v134_v37  ;;  %v205_v37 = vld [vmem:[#allocation2 + $0x3d0] sm:$0xff] }
  0x71   :  { %834 = vmatpush2.bf16.msra.mxu0 %v675_v57  ;;  %v166_v57 = vld [vmem:[#allocation2 + $0x298] sm:$0xff] }
  0x72   :  { %904 = vmatpush1.bf16.msra.mxu1 %v341_v58  ;;  %835 = vmatprep.subr.bf16.mxu0 %v668_v59  ;;  %v397_v58 = vunpack.c.l.s8.bf16 %v133_v45  ;;  %v477_v59 = vunpack.c.l.s8.bf16 %v173_v47  ;;  %v198_v45 = vld [vmem:[#allocation2 + $0x398] sm:$0xff] }
  0x73   :  { %905 = vmatprep.subr.bf16.mxu1 %v334_v60  ;;  %v470_v60 = vunpack.c.h.s8.bf16 %v166_v57  ;;  %v222_v47 = vld [vmem:[#allocation2 + $0x458] sm:$0xff] }
  0x75   :  { %836 = vmatpush2.bf16.msra.mxu0 %v667_v1  ;;  %v389_v1 = vunpack.c.h.s8.bf16 %v125_v63 }
  0x76   :  { %906 = vmatpush1.bf16.msra.mxu1 %v333_v2  ;;  %837 = vmatprep.subr.bf16.mxu0 %v660_v3  ;;  %v469_v2 = vunpack.c.h.s8.bf16 %v165_v0  ;;  %v382_v3 = vunpack.c.l.s8.bf16 %v126_v56  ;;  %v197_v56 = vld [vmem:[#allocation2 + $0x390] sm:$0xff] }
  0x77   :  { %907 = vmatprep.subr.bf16.mxu1 %v326_v4  ;;  %v462_v4 = vunpack.c.l.s8.bf16 %v166_v57  ;;  %v221_v57 = vld [vmem:[#allocation2 + $0x450] sm:$0xff] }
  0x79   :  { %838 = vmatpush2.bf16.msra.mxu0 %v659_v6  ;;  %v381_v6 = vunpack.c.l.s8.bf16 %v125_v63  ;;  %v190_v63 = vld [vmem:[#allocation2 + $0x358] sm:$0xff] }
  0x7a   :  { %908 = vmatpush1.bf16.msra.mxu1 %v325_v7  ;;  %839 = vmatprep.subr.bf16.mxu0 %v652_v8  ;;  %v461_v7 = vunpack.c.l.s8.bf16 %v165_v0  ;;  %v374_v8 = vunpack.c.h.s8.bf16 %v118_v41  ;;  %v214_v0 = vld [vmem:[#allocation2 + $0x418] sm:$0xff] }
  0x7b   :  { %909 = vmatprep.subr.bf16.mxu1 %v318_v9  ;;  %v454_v9 = vunpack.c.h.s8.bf16 %v158_v46 }
  0x7d   :  { %840 = vmatpush2.bf16.msra.mxu0 %v651_v13  ;;  %v373_v13 = vunpack.c.h.s8.bf16 %v117_v11 }
  0x7e   :  { %910 = vmatpush1.bf16.msra.mxu1 %v317_v14  ;;  %841 = vmatprep.subr.bf16.mxu0 %v644_v15  ;;  %v453_v14 = vunpack.c.h.s8.bf16 %v157_v12  ;;  %v366_v15 = vunpack.c.l.s8.bf16 %v118_v41  ;;  %v189_v41 = vld [vmem:[#allocation2 + $0x350] sm:$0xff] }
  0x7f   :  { %911 = vmatprep.subr.bf16.mxu1 %v310_v16  ;;  %v446_v16 = vunpack.c.l.s8.bf16 %v158_v46  ;;  %v213_v46 = vld [vmem:[#allocation2 + $0x410] sm:$0xff] }
  0x81   :  { %842 = vmatpush2.bf16.msra.mxu0 %v643_v19  ;;  %v365_v19 = vunpack.c.l.s8.bf16 %v117_v11  ;;  %v182_v11 = vld [vmem:[#allocation2 + $0x318] sm:$0xff] }
  0x82   :  { %912 = vmatpush1.bf16.msra.mxu1 %v309_v20  ;;  %843 = vmatprep.subr.bf16.mxu0 %v636_v21  ;;  %v445_v20 = vunpack.c.l.s8.bf16 %v157_v12  ;;  %v438_v21 = vunpack.c.h.s8.bf16 %v150_v17  ;;  %v270_v12 = vld [vmem:[#allocation2 + $0x5d8] sm:$0xff] }
  0x83   :  { %913 = vmatprep.subr.bf16.mxu1 %v302_v22  ;;  %v614_v22 = vunpack.c.h.s8.bf16 %v238_v18 }
  0x85   :  { %844 = vmatpush2.bf16.msra.mxu0 %v635_v25  ;;  %v437_v25 = vunpack.c.h.s8.bf16 %v149_v23 }
  0x86   :  { %914 = vmatpush1.bf16.msra.mxu1 %v301_v27  ;;  %845 = vmatprep.subr.bf16.mxu0 %v628_v28  ;;  %v613_v27 = vunpack.c.h.s8.bf16 %v237_v24  ;;  %v430_v28 = vunpack.c.l.s8.bf16 %v150_v17  ;;  %v181_v17 = vld [vmem:[#allocation2 + $0x310] sm:$0xff] }
  0x87   :  { %915 = vmatprep.subr.bf16.mxu1 %v422_v29  ;;  %v606_v29 = vunpack.c.l.s8.bf16 %v238_v18  ;;  %v269_v18 = vld [vmem:[#allocation2 + $0x5d0] sm:$0xff] }
  0x89   :  { %846 = vmatpush2.bf16.msra.mxu0 %v627_v32  ;;  %v429_v32 = vunpack.c.l.s8.bf16 %v149_v23  ;;  %v262_v23 = vld [vmem:[#allocation2 + $0x598] sm:$0xff] }
  0x8a   :  { %916 = vmatpush2.bf16.msra.mxu1 %v421_v33  ;;  %847 = vmatprep.subr.bf16.mxu0 %v620_v34  ;;  %v605_v33 = vunpack.c.l.s8.bf16 %v237_v24  ;;  %v550_v34 = vunpack.c.h.s8.bf16 %v206_v30  ;;  %v294_v24 = vld [vmem:[#allocation2 + $0x698] sm:$0xff] }
  0x8b   :  { %917 = vmatprep.subr.bf16.mxu1 %v414_v36  ;;  %v598_v36 = vunpack.c.h.s8.bf16 %v230_v31 }
  0x8d   :  { %848 = vmatpush2.bf16.msra.mxu0 %v619_v40  ;;  %v549_v40 = vunpack.c.h.s8.bf16 %v205_v37 }
  0x8e   :  { %918 = vmatpush2.bf16.msra.mxu1 %v413_v42  ;;  %940 = vmatprep.subr.bf16.mxu0 %v486_v44  ;;  %v597_v42 = vunpack.c.h.s8.bf16 %v229_v38  ;;  %v590_v44 = vunpack.c.l.s8.bf16 %v230_v31  ;;  %v293_v31 = vld [vmem:[#allocation2 + $0x690] sm:$0xff] }
  0x8f   :  { %919 = vmatprep.subr.bf16.mxu1 %v406_v43  ;;  %v542_v43 = vunpack.c.l.s8.bf16 %v206_v30  ;;  %v261_v30 = vld [vmem:[#allocation2 + $0x590] sm:$0xff] }
  0x90   :  { %850 = vmatmul.mubr.bf16.vlgmr.msra.gmra.mxu0 %v1667_v48 }
  0x91   :  { %941 = vmatpush1.bf16.msra.mxu0 %v485_v50  ;;  %972 = vmatprep.mubr.bf16.mxu0 %v1629_v55  ;;  %v589_v50 = vunpack.c.l.s8.bf16 %v229_v38  ;;  %v286_v38 = vld [vmem:[#allocation2 + $0x658] sm:$0xff] }
  0x92   :  { %920 = vmatpush2.bf16.msra.mxu1 %v405_v49  ;;  %942 = vmatprep.subr.bf16.mxu0 %v478_v54  ;;  %v541_v49 = vunpack.c.l.s8.bf16 %v205_v37  ;;  %v582_v54 = vunpack.c.h.s8.bf16 %v222_v47  ;;  %v254_v37 = vld [vmem:[#allocation2 + $0x558] sm:$0xff] }
  0x93   :  { %921 = vmatprep.subr.bf16.mxu1 %v398_v52  ;;  %v534_v52 = vunpack.c.h.s8.bf16 %v198_v45 }
  0x95   :  { %943 = vmatpush1.bf16.msra.mxu0 %v477_v59  ;;  %v581_v59 = vunpack.c.h.s8.bf16 %v221_v57 }
  0x96   :  { %922 = vmatpush2.bf16.msra.mxu1 %v397_v58  ;;  %944 = vmatprep.subr.bf16.mxu0 %v470_v60  ;;  %v533_v58 = vunpack.c.h.s8.bf16 %v197_v56  ;;  %v574_v60 = vunpack.c.l.s8.bf16 %v222_v47  ;;  %v285_v47 = vld [vmem:[#allocation2 + $0x650] sm:$0xff] }
  0x97   :  { %923 = vmatprep.subr.bf16.mxu1 %v390_v51  ;;  %v526_v51 = vunpack.c.l.s8.bf16 %v198_v45  ;;  %v253_v45 = vld [vmem:[#allocation2 + $0x550] sm:$0xff] }
  0x99   :  { %945 = vmatpush1.bf16.msra.mxu0 %v469_v2  ;;  %v573_v2 = vunpack.c.l.s8.bf16 %v221_v57  ;;  %v278_v57 = vld [vmem:[#allocation2 + $0x618] sm:$0xff] }
  0x9a   :  { %924 = vmatpush2.bf16.msra.mxu1 %v389_v1  ;;  %946 = vmatprep.subr.bf16.mxu0 %v462_v4  ;;  %v525_v1 = vunpack.c.l.s8.bf16 %v197_v56  ;;  %v566_v4 = vunpack.c.h.s8.bf16 %v214_v0  ;;  %v246_v56 = vld [vmem:[#allocation2 + $0x518] sm:$0xff] }
  0x9b   :  { %925 = vmatprep.subr.bf16.mxu1 %v382_v3  ;;  %v518_v3 = vunpack.c.h.s8.bf16 %v190_v63 }
  0x9d   :  { %947 = vmatpush1.bf16.msra.mxu0 %v461_v7  ;;  %v565_v7 = vunpack.c.h.s8.bf16 %v213_v46 }
  0x9e   :  { %926 = vmatpush2.bf16.msra.mxu1 %v381_v6  ;;  %948 = vmatprep.subr.bf16.mxu0 %v454_v9  ;;  %v517_v6 = vunpack.c.h.s8.bf16 %v189_v41  ;;  %v558_v9 = vunpack.c.l.s8.bf16 %v214_v0  ;;  %v277_v0 = vld [vmem:[#allocation2 + $0x610] sm:$0xff] }
  0x9f   :  { %927 = vmatprep.subr.bf16.mxu1 %v374_v8  ;;  %v510_v8 = vunpack.c.l.s8.bf16 %v190_v63  ;;  %v245_v63 = vld [vmem:[#allocation2 + $0x510] sm:$0xff] }
  0xa1   :  { %949 = vmatpush1.bf16.msra.mxu0 %v453_v14  ;;  %v557_v14 = vunpack.c.l.s8.bf16 %v213_v46  ;;  %v176_v46 = vld [vmem:[#allocation2 + $0x2e8] sm:$0xff] }
  0xa2   :  { %928 = vmatpush2.bf16.msra.mxu1 %v373_v13  ;;  %950 = vmatprep.subr.bf16.mxu0 %v446_v16  ;;  %v509_v13 = vunpack.c.l.s8.bf16 %v189_v41  ;;  %v678_v16 = vunpack.c.h.s8.bf16 %v270_v12  ;;  %v112_v41 = vld [vmem:[#allocation2 + $0xe8] sm:$0xff] }
  0xa3   :  { %929 = vmatprep.subr.bf16.mxu1 %v366_v15  ;;  %v502_v15 = vunpack.c.h.s8.bf16 %v182_v11 }
  0xa5   :  { %951 = vmatpush1.bf16.msra.mxu0 %v445_v20  ;;  %v677_v20 = vunpack.c.h.s8.bf16 %v269_v18 }
  0xa6   :  { %930 = vmatpush2.bf16.msra.mxu1 %v365_v19  ;;  %952 = vmatprep.subr.bf16.mxu0 %v438_v21  ;;  %v501_v19 = vunpack.c.h.s8.bf16 %v181_v17  ;;  %v494_v21 = vunpack.c.l.s8.bf16 %v182_v11  ;;  %v111_v11 = vld [vmem:[#allocation2 + $0xe0] sm:$0xff] }
  0xa7   :  { %981 = vmatprep.subr.bf16.mxu1 %v614_v22  ;;  %v670_v22 = vunpack.c.l.s8.bf16 %v270_v12  ;;  %v175_v12 = vld [vmem:[#allocation2 + $0x2e0] sm:$0xff] }
  0xa9   :  { %932 = vmatmul.mubr.bf16.vlgmr.msra.gmra.mxu1 %v1645_v61  ;;  %953 = vmatpush1.bf16.msra.mxu0 %v437_v25  ;;  %v493_v25 = vunpack.c.l.s8.bf16 %v181_v17  ;;  %v104_v17 = vld [vmem:[#allocation2 + $0xa8] sm:$0xff] }
  0xaa   :  { %982 = vmatpush1.bf16.msra.mxu1 %v613_v27  ;;  %954 = vmatprep.subr.bf16.mxu0 %v430_v28  ;;  %v669_v27 = vunpack.c.l.s8.bf16 %v269_v18  ;;  %v662_v28 = vunpack.c.h.s8.bf16 %v262_v23  ;;  %v168_v18 = vld [vmem:[#allocation2 + $0x2a8] sm:$0xff] }
  0xab   :  { %983 = vmatprep.subr.bf16.mxu1 %v606_v29  ;;  %1013 = vmatprep.mubr.bf16.mxu1 %v1651_v5  ;;  %v726_v29 = vunpack.c.h.s8.bf16 %v294_v24 }
  0xad   :  { %955 = vmatpush1.bf16.msra.mxu0 %v429_v32  ;;  %v661_v32 = vunpack.c.h.s8.bf16 %v261_v30 }
  0xae   :  { %984 = vmatpush1.bf16.msra.mxu1 %v605_v33  ;;  %956 = vmatprep.subr.bf16.mxu0 %v550_v34  ;;  %v725_v33 = vunpack.c.h.s8.bf16 %v293_v31  ;;  %v654_v34 = vunpack.c.l.s8.bf16 %v262_v23  ;;  %v103_v23 = vld [vmem:[#allocation2 + $0xa0] sm:$0xff] }
  0xaf   :  { %985 = vmatprep.subr.bf16.mxu1 %v598_v36  ;;  %v718_v36 = vunpack.c.l.s8.bf16 %v294_v24  ;;  %v167_v24 = vld [vmem:[#allocation2 + $0x2a0] sm:$0xff] }
  0xb1   :  { %957 = vmatpush2.bf16.msra.mxu0 %v549_v40  ;;  %v653_v40 = vunpack.c.l.s8.bf16 %v261_v30  ;;  %v96_v30 = vld [vmem:[#allocation2 + $0x68] sm:$0xff] }
  0xb2   :  { %986 = vmatpush1.bf16.msra.mxu1 %v597_v42  ;;  %958 = vmatprep.subr.bf16.mxu0 %v542_v43  ;;  %v717_v42 = vunpack.c.l.s8.bf16 %v293_v31  ;;  %v646_v43 = vunpack.c.h.s8.bf16 %v254_v37  ;;  %v160_v31 = vld [vmem:[#allocation2 + $0x268] sm:$0xff] }
  0xb3   :  { %987 = vmatprep.subr.bf16.mxu1 %v590_v44  ;;  %v710_v44 = vunpack.c.h.s8.bf16 %v286_v38 }
  0xb5   :  { %959 = vmatpush2.bf16.msra.mxu0 %v541_v49  ;;  %v645_v49 = vunpack.c.h.s8.bf16 %v253_v45 }
  0xb6   :  { %988 = vmatpush1.bf16.msra.mxu1 %v589_v50  ;;  %960 = vmatprep.subr.bf16.mxu0 %v534_v52  ;;  %v709_v50 = vunpack.c.h.s8.bf16 %v285_v47  ;;  %v638_v52 = vunpack.c.l.s8.bf16 %v254_v37  ;;  %v95_v37 = vld [vmem:[#allocation2 + $0x60] sm:$0xff] }
  0xb7   :  { %989 = vmatprep.subr.bf16.mxu1 %v582_v54  ;;  %v702_v54 = vunpack.c.l.s8.bf16 %v286_v38  ;;  %v159_v38 = vld [vmem:[#allocation2 + $0x260] sm:$0xff] }
  0xb9   :  { %961 = vmatpush2.bf16.msra.mxu0 %v533_v58  ;;  %v637_v58 = vunpack.c.l.s8.bf16 %v253_v45  ;;  %v88_v45 = vld [vmem:[#allocation2 + $0x28] sm:$0xff] }
  0xba   :  { %990 = vmatpush1.bf16.msra.mxu1 %v581_v59  ;;  %962 = vmatprep.subr.bf16.mxu0 %v526_v51  ;;  %v701_v59 = vunpack.c.l.s8.bf16 %v285_v47  ;;  %v630_v51 = vunpack.c.h.s8.bf16 %v246_v56  ;;  %v152_v47 = vld [vmem:[#allocation2 + $0x228] sm:$0xff] }
  0xbb   :  { %991 = vmatprep.subr.bf16.mxu1 %v574_v60  ;;  %v694_v60 = vunpack.c.h.s8.bf16 %v278_v57 }
  0xbd   :  { %963 = vmatpush2.bf16.msra.mxu0 %v525_v1  ;;  %v629_v1 = vunpack.c.h.s8.bf16 %v245_v63 }
  0xbe   :  { %992 = vmatpush1.bf16.msra.mxu1 %v573_v2  ;;  %964 = vmatprep.subr.bf16.mxu0 %v518_v3  ;;  %v693_v2 = vunpack.c.h.s8.bf16 %v277_v0  ;;  %v622_v3 = vunpack.c.l.s8.bf16 %v246_v56  ;;  %v87_v56 = vld [vmem:[#allocation2 + $0x20] sm:$0xff] }
  0xbf   :  { %993 = vmatprep.subr.bf16.mxu1 %v566_v4  ;;  %v686_v4 = vunpack.c.l.s8.bf16 %v278_v57  ;;  %v151_v57 = vld [vmem:[#allocation2 + $0x220] sm:$0xff] }
  0xc1   :  { %965 = vmatpush2.bf16.msra.mxu0 %v517_v6  ;;  %v621_v6 = vunpack.c.l.s8.bf16 %v245_v63  ;;  %v144_v63 = vld [vmem:[#allocation2 + $0x1e8] sm:$0xff] }
  0xc2   :  { %994 = vmatpush1.bf16.msra.mxu1 %v565_v7  ;;  %966 = vmatprep.subr.bf16.mxu0 %v510_v8  ;;  %v685_v7 = vunpack.c.l.s8.bf16 %v277_v0  ;;  %v360_v8 = vunpack.c.h.s8.bf16 %v112_v41  ;;  %v208_v0 = vld [vmem:[#allocation2 + $0x3e8] sm:$0xff] }
  0xc3   :  { %995 = vmatprep.subr.bf16.mxu1 %v558_v9  ;;  %v488_v9 = vunpack.c.h.s8.bf16 %v176_v46 }
  0xc5   :  { %967 = vmatpush2.bf16.msra.mxu0 %v509_v13  ;;  %v359_v13 = vunpack.c.h.s8.bf16 %v111_v11 }
  0xc6   :  { %996 = vmatpush1.bf16.msra.mxu1 %v557_v14  ;;  %968 = vmatprep.subr.bf16.mxu0 %v502_v15  ;;  %v487_v14 = vunpack.c.h.s8.bf16 %v175_v12  ;;  %v352_v15 = vunpack.c.l.s8.bf16 %v112_v41  ;;  %v143_v41 = vld [vmem:[#allocation2 + $0x1e0] sm:$0xff] }
  0xc7   :  { %997 = vmatprep.subr.bf16.mxu1 %v678_v16  ;;  %v480_v16 = vunpack.c.l.s8.bf16 %v176_v46  ;;  %v207_v46 = vld [vmem:[#allocation2 + $0x3e0] sm:$0xff] }
  0xc9   :  { %969 = vmatpush2.bf16.msra.mxu0 %v501_v19  ;;  %v351_v19 = vunpack.c.l.s8.bf16 %v111_v11  ;;  %v136_v11 = vld [vmem:[#allocation2 + $0x1a8] sm:$0xff] }
  0xca   :  { %998 = vmatpush2.bf16.msra.mxu1 %v677_v20  ;;  %970 = vmatprep.subr.bf16.mxu0 %v494_v21  ;;  %v479_v20 = vunpack.c.l.s8.bf16 %v175_v12  ;;  %v344_v21 = vunpack.c.h.s8.bf16 %v104_v17  ;;  %v200_v12 = vld [vmem:[#allocation2 + $0x3a8] sm:$0xff] }
  0xcb   :  { %999 = vmatprep.subr.bf16.mxu1 %v670_v22  ;;  %v472_v22 = vunpack.c.h.s8.bf16 %v168_v18 }
  0xcd   :  { %971 = vmatpush2.bf16.msra.mxu0 %v493_v25  ;;  %v343_v25 = vunpack.c.h.s8.bf16 %v103_v23 }
  0xce   :  { %1000 = vmatpush2.bf16.msra.mxu1 %v669_v27  ;;  %1026 = vmatprep.subr.bf16.mxu0 %v726_v29  ;;  %v471_v27 = vunpack.c.h.s8.bf16 %v167_v24  ;;  %v464_v29 = vunpack.c.l.s8.bf16 %v168_v18  ;;  %v199_v18 = vld [vmem:[#allocation2 + $0x3a0] sm:$0xff] }
  0xcf   :  { %1001 = vmatprep.subr.bf16.mxu1 %v662_v28  ;;  %v336_v28 = vunpack.c.l.s8.bf16 %v104_v17  ;;  %v135_v17 = vld [vmem:[#allocation2 + $0x1a0] sm:$0xff] }
  0xd0   :  { %973 = vmatmul.mubr.bf16.vlgmr.msra.gmra.mxu0 %v1649_v62 }
  0xd1   :  { %1027 = vmatpush1.bf16.msra.mxu0 %v725_v33  ;;  %1054 = vmatprep.mubr.bf16.mxu0 %v1579_v10  ;;  %v463_v33 = vunpack.c.l.s8.bf16 %v167_v24  ;;  %v192_v24 = vld [vmem:[#allocation2 + $0x368] sm:$0xff] }
  0xd2   :  { %1002 = vmatpush2.bf16.msra.mxu1 %v661_v32  ;;  %1028 = vmatprep.subr.bf16.mxu0 %v718_v36  ;;  %v335_v32 = vunpack.c.l.s8.bf16 %v103_v23  ;;  %v456_v36 = vunpack.c.h.s8.bf16 %v160_v31  ;;  %v128_v23 = vld [vmem:[#allocation2 + $0x168] sm:$0xff] }
  0xd3   :  { %1003 = vmatprep.subr.bf16.mxu1 %v654_v34  ;;  %v328_v34 = vunpack.c.h.s8.bf16 %v96_v30 }
  0xd5   :  { %1029 = vmatpush1.bf16.msra.mxu0 %v717_v42  ;;  %v455_v42 = vunpack.c.h.s8.bf16 %v159_v38 }
  0xd6   :  { %1004 = vmatpush2.bf16.msra.mxu1 %v653_v40  ;;  %1030 = vmatprep.subr.bf16.mxu0 %v710_v44  ;;  %v327_v40 = vunpack.c.h.s8.bf16 %v95_v37  ;;  %v448_v44 = vunpack.c.l.s8.bf16 %v160_v31 }
  0xd7   :  { %1005 = vmatprep.subr.bf16.mxu1 %v646_v43  ;;  %v320_v43 = vunpack.c.l.s8.bf16 %v96_v30  ;;  %v527_v30 = vunpack.c.l.s8.bf16 %v199_v18 }
  0xd9   :  { %1031 = vmatpush1.bf16.msra.mxu0 %v709_v50  ;;  %v447_v50 = vunpack.c.l.s8.bf16 %v159_v38 }
  0xda   :  { %1006 = vmatpush2.bf16.msra.mxu1 %v645_v49  ;;  %1032 = vmatprep.subr.bf16.mxu0 %v702_v54  ;;  %v319_v49 = vunpack.c.l.s8.bf16 %v95_v37  ;;  %v440_v54 = vunpack.c.h.s8.bf16 %v152_v47  ;;  %v191_v37 = vld [vmem:[#allocation2 + $0x360] sm:$0xff] }
  0xdb   :  { %1007 = vmatprep.subr.bf16.mxu1 %v638_v52  ;;  %v312_v52 = vunpack.c.h.s8.bf16 %v88_v45 }
  0xdd   :  { %1033 = vmatpush1.bf16.msra.mxu0 %v701_v59  ;;  %v439_v59 = vunpack.c.h.s8.bf16 %v151_v57 }
  0xde   :  { %1008 = vmatpush2.bf16.msra.mxu1 %v637_v58  ;;  %1034 = vmatprep.subr.bf16.mxu0 %v694_v60  ;;  %v311_v58 = vunpack.c.h.s8.bf16 %v87_v56  ;;  %v432_v60 = vunpack.c.l.s8.bf16 %v152_v47 }
  0xdf   :  { %1009 = vmatprep.subr.bf16.mxu1 %v630_v51  ;;  %v304_v51 = vunpack.c.l.s8.bf16 %v88_v45 }
  0xe1   :  { %1035 = vmatpush1.bf16.msra.mxu0 %v693_v2  ;;  %v431_v2 = vunpack.c.l.s8.bf16 %v151_v57  ;;  %v511_v57 = vunpack.c.l.s8.bf16 %v191_v37 }
  0xe2   :  { %1010 = vmatpush2.bf16.msra.mxu1 %v629_v1  ;;  %1036 = vmatprep.subr.bf16.mxu0 %v686_v4  ;;  %v303_v1 = vunpack.c.l.s8.bf16 %v87_v56  ;;  %v552_v4 = vunpack.c.h.s8.bf16 %v208_v0 }
  0xe3   :  { %1011 = vmatprep.subr.bf16.mxu1 %v622_v3  ;;  %v424_v3 = vunpack.c.h.s8.bf16 %v144_v63 }
  0xe5   :  { %1037 = vmatpush1.bf16.msra.mxu0 %v685_v7  ;;  %v551_v7 = vunpack.c.h.s8.bf16 %v207_v46 }
  0xe6   :  { %1012 = vmatpush2.bf16.msra.mxu1 %v621_v6  ;;  %1063 = vmatprep.subr.bf16.mxu0 %v360_v8  ;;  %v423_v6 = vunpack.c.h.s8.bf16 %v143_v41  ;;  %v416_v8 = vunpack.c.l.s8.bf16 %v144_v63 }
  0xe7   :  { %1104 = vmatprep.subr.bf16.mxu1 %v488_v9  ;;  %v544_v9 = vunpack.c.l.s8.bf16 %v208_v0 }
  0xe8   :  { %1543 = vmatmul.mubr.msk.bf16.vlgmr.msra.gmra.mxu0 %vm731_vm0, %v1660_v39 }
  0xe9   :  { %1014 = vmatmul.mubr.bf16.vlgmr.msra.gmra.mxu1 %v1667_v48  ;;  %1064 = vmatpush1.bf16.msra.mxu0 %v359_v13  ;;  %v415_v13 = vunpack.c.l.s8.bf16 %v143_v41 }
  0xea   :  { %1105 = vmatpush1.bf16.msra.mxu1 %v487_v14  ;;  %1065 = vmatprep.subr.bf16.mxu0 %v352_v15  ;;  %v543_v14 = vunpack.c.l.s8.bf16 %v207_v46  ;;  %v408_v15 = vunpack.c.h.s8.bf16 %v136_v11 }
  0xeb   :  { %1106 = vmatprep.subr.bf16.mxu1 %v480_v16  ;;  %1095 = vmatprep.mubr.bf16.mxu0 %v1624_v53  ;;  %v536_v16 = vunpack.c.h.s8.bf16 %v200_v12 }
  0xec   :  { %1136 = vmatprep.mubr.bf16.mxu1 %v1629_v55 }
  0xed   :  { %1066 = vmatpush1.bf16.msra.mxu0 %v351_v19  ;;  %v407_v19 = vunpack.c.h.s8.bf16 %v135_v17 }
  0xee   :  { %1107 = vmatpush1.bf16.msra.mxu1 %v479_v20  ;;  %1067 = vmatprep.subr.bf16.mxu0 %v344_v21  ;;  %v535_v20 = vunpack.c.h.s8.bf16 %v199_v18  ;;  %v400_v21 = vunpack.c.l.s8.bf16 %v136_v11 }
  0xef   :  { %1108 = vmatprep.subr.bf16.mxu1 %v472_v22  ;;  %v528_v22 = vunpack.c.l.s8.bf16 %v200_v12 }
  0xf1   :  { %1068 = vmatpush1.bf16.msra.mxu0 %v343_v25 }
  0xf2   :  { %1109 = vmatpush1.bf16.msra.mxu1 %v471_v27  ;;  %1069 = vmatprep.subr.bf16.mxu0 %v336_v28 }
  0xf3   :  { %1110 = vmatprep.subr.bf16.mxu1 %v464_v29  ;;  %v399_v29 = vunpack.c.l.s8.bf16 %v135_v17 }
  0xf5   :  { %1070 = vmatpush1.bf16.msra.mxu0 %v335_v32 }
  0xf6   :  { %1111 = vmatpush1.bf16.msra.mxu1 %v463_v33  ;;  %1071 = vmatprep.subr.bf16.mxu0 %v328_v34  ;;  %v392_v33 = vunpack.c.h.s8.bf16 %v128_v23  ;;  %v520_v34 = vunpack.c.h.s8.bf16 %v192_v24 }
  0xf7   :  { %1112 = vmatprep.subr.bf16.mxu1 %v456_v36  ;;  %v127_v36 = vld [vmem:[#allocation2 + $0x160] sm:$0xff] }
  0xf8   :  { %v383_v56 = vunpack.c.l.s8.bf16 %v127_v36 }
  0xf9   :  { %1072 = vmatpush1.bf16.msra.mxu0 %v327_v40 }
  0xfa   :  { %1113 = vmatpush1.bf16.msra.mxu1 %v455_v42  ;;  %1073 = vmatprep.subr.bf16.mxu0 %v320_v43  ;;  %v391_v43 = vunpack.c.h.s8.bf16 %v127_v36 }
  0xfb   :  { %1114 = vmatprep.subr.bf16.mxu1 %v448_v44  ;;  %v519_v44 = vunpack.c.h.s8.bf16 %v191_v37 }
  0xfd   :  { %1074 = vmatpush1.bf16.msra.mxu0 %v319_v49  ;;  %v384_v49 = vunpack.c.l.s8.bf16 %v128_v23  ;;  %v231_v23 = vld [vmem:[#allocation2 + $0x4a0] sm:$0xff] }
  0xfe   :  { %1115 = vmatpush1.bf16.msra.mxu1 %v447_v50  ;;  %1075 = vmatprep.subr.bf16.mxu0 %v312_v52  ;;  %v512_v50 = vunpack.c.l.s8.bf16 %v192_v24  ;;  %v120_v52 = vld [vmem:[#allocation2 + $0x128] sm:$0xff]  ;;  %v287_v24 = vld [vmem:[#allocation2 + $0x660] sm:$0xff]  ;;  %v591_v36 = vunpack.c.l.s8.bf16 %v231_v23 }
  0xff   :  { %1116 = vmatprep.subr.bf16.mxu1 %v440_v54  ;;  %v184_v54 = vld [vmem:[#allocation2 + $0x328] sm:$0xff]  ;;  %v703_v37 = vunpack.c.l.s8.bf16 %v287_v24 }
 0x101   :  { %1076 = vmatpush1.bf16.msra.mxu0 %v311_v58  ;;  %v376_v58 = vunpack.c.h.s8.bf16 %v120_v52 }
 0x102   :  { %1117 = vmatpush1.bf16.msra.mxu1 %v439_v59  ;;  %1077 = vmatprep.subr.bf16.mxu0 %v304_v51  ;;  %v504_v59 = vunpack.c.h.s8.bf16 %v184_v54  ;;  %v119_v51 = vld [vmem:[#allocation2 + $0x120] sm:$0xff] }
 0x103   :  { %1118 = vmatprep.subr.bf16.mxu1 %v432_v60  ;;  %v183_v60 = vld [vmem:[#allocation2 + $0x320] sm:$0xff]  ;;  %v375_v63 = vunpack.c.h.s8.bf16 %v119_v51  ;;  %v367_v41 = vunpack.c.l.s8.bf16 %v119_v51 }
 0x104   :  { %v503_v0 = vunpack.c.h.s8.bf16 %v183_v60  ;;  %v495_v46 = vunpack.c.l.s8.bf16 %v183_v60  ;;  %v215_v51 = vld [vmem:[#allocation2 + $0x420] sm:$0xff]  ;;  %v113_v60 = vld [vmem:[#allocation2 + $0xf0] sm:$0xff] }
 0x105   :  { %1078 = vmatpush1.bf16.msra.mxu0 %v303_v1  ;;  %v368_v1 = vunpack.c.l.s8.bf16 %v120_v52  ;;  %v216_v52 = vld [vmem:[#allocation2 + $0x428] sm:$0xff] }
 0x106   :  { %1119 = vmatpush1.bf16.msra.mxu1 %v431_v2  ;;  %1079 = vmatprep.subr.bf16.mxu0 %v424_v3  ;;  %v496_v2 = vunpack.c.l.s8.bf16 %v184_v54  ;;  %v240_v3 = vld [vmem:[#allocation2 + $0x4e8] sm:$0xff]  ;;  %v114_v54 = vld [vmem:[#allocation2 + $0xf8] sm:$0xff] }
 0x107   :  { %1120 = vmatprep.subr.bf16.mxu1 %v552_v4  ;;  %v296_v4 = vld [vmem:[#allocation2 + $0x6a8] sm:$0xff] }
 0x109   :  { %1080 = vmatpush2.bf16.msra.mxu0 %v423_v6  ;;  %v616_v6 = vunpack.c.h.s8.bf16 %v240_v3 }
 0x10a   :  { %1121 = vmatpush2.bf16.msra.mxu1 %v551_v7  ;;  %1081 = vmatprep.subr.bf16.mxu0 %v416_v8  ;;  %v728_v7 = vunpack.c.h.s8.bf16 %v296_v4  ;;  %v239_v8 = vld [vmem:[#allocation2 + $0x4e0] sm:$0xff] }
 0x10b   :  { %1122 = vmatprep.subr.bf16.mxu1 %v544_v9  ;;  %v295_v9 = vld [vmem:[#allocation2 + $0x6a0] sm:$0xff]  ;;  %v615_v11 = vunpack.c.h.s8.bf16 %v239_v8  ;;  %v607_v18 = vunpack.c.l.s8.bf16 %v239_v8 }
 0x10c   :  { %v727_v12 = vunpack.c.h.s8.bf16 %v295_v9  ;;  %v271_v8 = vld [vmem:[#allocation2 + $0x5e0] sm:$0xff] }
 0x10d   :  { %1082 = vmatpush2.bf16.msra.mxu0 %v415_v13  ;;  %v608_v13 = vunpack.c.l.s8.bf16 %v240_v3  ;;  %v272_v3 = vld [vmem:[#allocation2 + $0x5e8] sm:$0xff] }
 0x10e   :  { %1123 = vmatpush2.bf16.msra.mxu1 %v543_v14  ;;  %1083 = vmatprep.subr.bf16.mxu0 %v408_v15  ;;  %v720_v14 = vunpack.c.l.s8.bf16 %v296_v4  ;;  %v232_v15 = vld [vmem:[#allocation2 + $0x4a8] sm:$0xff]  ;;  %v106_v4 = vld [vmem:[#allocation2 + $0xb8] sm:$0xff] }
 0x10f   :  { %1124 = vmatprep.subr.bf16.mxu1 %v536_v16  ;;  %v288_v16 = vld [vmem:[#allocation2 + $0x668] sm:$0xff] }
 0x110   :  { %v769_v25 = vpop.f32.mrf.mxu0 }
 0x111   :  { %v810_v27 = vpop.f32.mrf.mxu1  ;;  %1084 = vmatpush2.bf16.msra.mxu0 %v407_v19  ;;  %v719_v19 = vunpack.c.l.s8.bf16 %v295_v9  ;;  %v105_v9 = vld [vmem:[#allocation2 + $0xb0] sm:$0xff] }
 0x112   :  { %v1680_v28 = vadd.f32 %v810_v27, %v769_v25  ;;  %1125 = vmatpush2.bf16.msra.mxu1 %v535_v20  ;;  %v771_v31 = vpop.f32.mrf.mxu0  ;;  %1085 = vmatprep.subr.bf16.mxu0 %v400_v21  ;;  %v600_v21 = vunpack.c.h.s8.bf16 %v232_v15  ;;  %v599_v27 = vunpack.c.h.s8.bf16 %v231_v23  ;;  %v263_v23 = vld [vmem:[#allocation2 + $0x5a0] sm:$0xff] }
 0x113   :  { %v812_v32 = vpop.f32.mrf.mxu1  ;;  %1126 = vmatprep.subr.bf16.mxu1 %v528_v22  ;;  %v712_v22 = vunpack.c.h.s8.bf16 %v288_v16 }
 0x114   :  { %v1682_v38 = vadd.f32 %v812_v32, %v771_v31  ;;  %v773_v40 = vpop.f32.mrf.mxu0  ;;  %v592_v31 = vunpack.c.l.s8.bf16 %v232_v15  ;;  %v704_v32 = vunpack.c.l.s8.bf16 %v288_v16  ;;  %v264_v15 = vld [vmem:[#allocation2 + $0x5a8] sm:$0xff]  ;;  %v98_v16 = vld [vmem:[#allocation2 + $0x78] sm:$0xff] }
 0x115   :  { %v814_v42 = vpop.f32.mrf.mxu1  ;;  %1086 = vmatpush2.bf16.msra.mxu0 %v399_v29  ;;  %v711_v29 = vunpack.c.h.s8.bf16 %v287_v24  ;;  %v1395_v24 = vsub.s32 0, %v1608_v26 }
 0x116   :  { %1127 = vmatpush2.bf16.msra.mxu1 %v527_v30  ;;  %v774_v45 = vpop.f32.mrf.mxu0  ;;  %1087 = vmatprep.subr.bf16.mxu0 %v392_v33  ;;  %v224_v33 = vld [vmem:[#allocation2 + $0x468] sm:$0xff] }
 0x117   :  { %v815_v47 = vpop.f32.mrf.mxu1  ;;  %1128 = vmatprep.subr.bf16.mxu1 %v520_v34  ;;  %v280_v34 = vld [vmem:[#allocation2 + $0x628] sm:$0xff]  ;;  %v584_v40 = vunpack.c.h.s8.bf16 %v224_v33 }
 0x118   :  { %v696_v42 = vunpack.c.h.s8.bf16 %v280_v34 }
 0x119   :  { %1088 = vmatpush2.bf16.msra.mxu0 %v391_v43  ;;  %v223_v43 = vld [vmem:[#allocation2 + $0x460] sm:$0xff] }
 0x11a   :  { %1129 = vmatpush2.bf16.msra.mxu1 %v519_v44  ;;  %1089 = vmatprep.subr.bf16.mxu0 %v384_v49  ;;  %v279_v44 = vld [vmem:[#allocation2 + $0x620] sm:$0xff]  ;;  %v583_v45 = vunpack.c.h.s8.bf16 %v223_v43  ;;  %v576_v49 = vunpack.c.l.s8.bf16 %v224_v33  ;;  %v256_v33 = vld [vmem:[#allocation2 + $0x568] sm:$0xff] }
 0x11b   :  { %1130 = vmatprep.subr.bf16.mxu1 %v512_v50  ;;  %v695_v47 = vunpack.c.h.s8.bf16 %v279_v44  ;;  %v688_v50 = vunpack.c.l.s8.bf16 %v280_v34  ;;  %v90_v34 = vld [vmem:[#allocation2 + $0x38] sm:$0xff] }
 0x11d   :  { %1090 = vmatpush2.bf16.msra.mxu0 %v383_v56  ;;  %v575_v56 = vunpack.c.l.s8.bf16 %v223_v43  ;;  %v655_v43 = vunpack.c.l.s8.bf16 %v263_v23 }
 0x11e   :  { %1131 = vmatpush2.bf16.msra.mxu1 %v511_v57  ;;  %1091 = vmatprep.subr.bf16.mxu0 %v376_v58  ;;  %v687_v57 = vunpack.c.l.s8.bf16 %v279_v44  ;;  %v568_v58 = vunpack.c.h.s8.bf16 %v216_v52 }
 0x11f   :  { %1132 = vmatprep.subr.bf16.mxu1 %v504_v59  ;;  %v362_v59 = vunpack.c.h.s8.bf16 %v114_v54 }
 0x121   :  { %1092 = vmatpush2.bf16.msra.mxu0 %v375_v63  ;;  %v567_v63 = vunpack.c.h.s8.bf16 %v215_v51 }
 0x122   :  { %1133 = vmatpush2.bf16.msra.mxu1 %v503_v0  ;;  %1093 = vmatprep.subr.bf16.mxu0 %v368_v1  ;;  %v361_v0 = vunpack.c.h.s8.bf16 %v113_v60  ;;  %v560_v1 = vunpack.c.l.s8.bf16 %v216_v52  ;;  %v89_v52 = vld [vmem:[#allocation2 + $0x30] sm:$0xff] }
 0x123   :  { %1134 = vmatprep.subr.bf16.mxu1 %v496_v2  ;;  %v354_v2 = vunpack.c.l.s8.bf16 %v114_v54 }
 0x125   :  { %1094 = vmatpush2.bf16.msra.mxu0 %v367_v41  ;;  %v559_v41 = vunpack.c.l.s8.bf16 %v215_v51 }
 0x126   :  { %1135 = vmatpush2.bf16.msra.mxu1 %v495_v46  ;;  %1145 = vmatprep.subr.bf16.mxu0 %v616_v6  ;;  %v353_v46 = vunpack.c.l.s8.bf16 %v113_v60  ;;  %v680_v6 = vunpack.c.h.s8.bf16 %v272_v3 }
 0x127   :  { %1190 = vmatprep.subr.bf16.mxu1 %v728_v7  ;;  %v346_v7 = vunpack.c.h.s8.bf16 %v106_v4 }
 0x128   :  { %1096 = vmatmul.mubr.bf16.vlgmr.msra.gmra.mxu0 %v1645_v61 }
 0x129   :  { %v1684_v17 = vpop.f32.mrf.mxu1  ;;  %1137 = vmatmul.mubr.bf16.vlgmr.msra.gmra.mxu1 %v1649_v62  ;;  %1146 = vmatpush1.bf16.msra.mxu0 %v615_v11  ;;  %v679_v11 = vunpack.c.h.s8.bf16 %v271_v8 }
 0x12a   :  { %1191 = vmatpush1.bf16.msra.mxu1 %v727_v12  ;;  %1147 = vmatprep.subr.bf16.mxu0 %v608_v13  ;;  %v345_v12 = vunpack.c.h.s8.bf16 %v105_v9  ;;  %v672_v13 = vunpack.c.l.s8.bf16 %v272_v3  ;;  %v248_v3 = vld [vmem:[#allocation2 + $0x528] sm:$0xff] }
 0x12b   :  { %v1688_v20 = vpop.f32.mrf.mxu1  ;;  %1192 = vmatprep.subr.bf16.mxu1 %v720_v14  ;;  %1218 = vmatprep.mubr.bf16.mxu1 %v1579_v10  ;;  %v338_v14 = vunpack.c.l.s8.bf16 %v106_v4  ;;  %v146_v4 = vld [vmem:[#allocation2 + $0x1f8] sm:$0xff] }
 0x12c   :  { %1177 = vmatprep.mubr.bf16.mxu0 %v1651_v5 }
 0x12d   :  { %v896_v25 = vpop.f32.mrf.mxu1  ;;  %1148 = vmatpush1.bf16.msra.mxu0 %v607_v18  ;;  %v671_v18 = vunpack.c.l.s8.bf16 %v271_v8  ;;  %v426_v8 = vunpack.c.h.s8.bf16 %v146_v4 }
 0x12e   :  { %1193 = vmatpush1.bf16.msra.mxu1 %v719_v19  ;;  %1149 = vmatprep.subr.bf16.mxu0 %v600_v21  ;;  %v337_v19 = vunpack.c.l.s8.bf16 %v105_v9  ;;  %v664_v21 = vunpack.c.h.s8.bf16 %v264_v15  ;;  %v663_v25 = vunpack.c.h.s8.bf16 %v263_v23  ;;  %v247_v9 = vld [vmem:[#allocation2 + $0x520] sm:$0xff] }
 0x12f   :  { %v897_v30 = vpop.f32.mrf.mxu1  ;;  %1194 = vmatprep.subr.bf16.mxu1 %v712_v22  ;;  %v330_v22 = vunpack.c.h.s8.bf16 %v98_v16 }
 0x130   :  { %v656_v30 = vunpack.c.l.s8.bf16 %v264_v15  ;;  %v624_v15 = vunpack.c.l.s8.bf16 %v248_v3 }
 0x131   :  { %1150 = vmatpush1.bf16.msra.mxu0 %v599_v27 }
 0x132   :  { %1195 = vmatpush1.bf16.msra.mxu1 %v711_v29  ;;  %1151 = vmatprep.subr.bf16.mxu0 %v592_v31  ;;  %v1699_v29 = vld [vmem:[%s1775_s2] sm:$0xff]  ;;  %v322_v31 = vunpack.c.l.s8.bf16 %v98_v16  ;;  %v418_v16 = vunpack.c.l.s8.bf16 %v146_v4  ;;  %v154_v4 = vld [vmem:[#allocation2 + $0x238] sm:$0xff] }
 0x133   :  { %1196 = vmatprep.subr.bf16.mxu1 %v704_v32  ;;  %v1399_v32 = vsub.s32 1, %v1608_v26 }
 0x135   :  { %1152 = vmatpush1.bf16.msra.mxu0 %v591_v36 }
 0x136   :  { %1197 = vmatpush1.bf16.msra.mxu1 %v703_v37  ;;  %1153 = vmatprep.subr.bf16.mxu0 %v584_v40  ;;  %v1396_v40 = vrot.slane %v1699_v29, %v1395_v24 }
 0x137   :  { %1198 = vmatprep.subr.bf16.mxu1 %v696_v42  ;;  %v1707_v42 = vld [vmem:[%s1776_s3] sm:$0xff] }
 0x139   :  { %1154 = vmatpush1.bf16.msra.mxu0 %v583_v45 }
 0x13a   :  { %1199 = vmatpush1.bf16.msra.mxu1 %v695_v47  ;;  %1155 = vmatprep.subr.bf16.mxu0 %v576_v49  ;;  %v648_v47 = vunpack.c.h.s8.bf16 %v256_v33  ;;  %v314_v49 = vunpack.c.h.s8.bf16 %v90_v34 }
 0x13b   :  { %1200 = vmatprep.subr.bf16.mxu1 %v688_v50  ;;  %v255_v50 = vld [vmem:[#allocation2 + $0x560] sm:$0xff] }
 0x13d   :  { %1156 = vmatpush1.bf16.msra.mxu0 %v575_v56  ;;  %v1400_v56 = vrot.slane %v1699_v29, %v1399_v32 }
 0x13e   :  { %1201 = vmatpush1.bf16.msra.mxu1 %v687_v57  ;;  %1157 = vmatprep.subr.bf16.mxu0 %v568_v58  ;;  %v1446_v57 = vrot.slane %v1707_v42, %v1395_v24  ;;  %v1450_v58 = vrot.slane %v1707_v42, %v1399_v32  ;;  %v137_v24 = vld [vmem:[#allocation2 + $0x1b0] sm:$0xff] }
 0x13f   :  { %1227 = vmatprep.subr.bf16.mxu1 %v362_v59 }
 0x141   :  { %1544 = vmatmul.mubr.msk.bf16.vlgmr.msra.gmra.mxu1 %vm731_vm0, %v1660_v39  ;;  %1158 = vmatpush1.bf16.msra.mxu0 %v567_v63  ;;  %v647_v63 = vunpack.c.h.s8.bf16 %v255_v50 }
 0x142   :  { %1228 = vmatpush1.bf16.msra.mxu1 %v361_v0  ;;  %1159 = vmatprep.subr.bf16.mxu0 %v560_v1  ;;  %v313_v0 = vunpack.c.h.s8.bf16 %v89_v52 }
 0x143   :  { %1229 = vmatprep.subr.bf16.mxu1 %v354_v2  ;;  %1259 = vmatprep.mubr.bf16.mxu1 %v1624_v53  ;;  %v97_v53 = vld [vmem:[#allocation2 + $0x70] sm:$0xff]  ;;  %v306_v2 = vunpack.c.l.s8.bf16 %v90_v34  ;;  %v170_v34 = vld [vmem:[#allocation2 + $0x2b8] sm:$0xff] }
 0x144   :  { %v329_v27 = vunpack.c.h.s8.bf16 %v97_v53  ;;  %v321_v44 = vunpack.c.l.s8.bf16 %v97_v53 }
 0x145   :  { %1160 = vmatpush1.bf16.msra.mxu0 %v559_v41 }
 0x146   :  { %1230 = vmatpush1.bf16.msra.mxu1 %v353_v46  ;;  %1161 = vmatprep.subr.bf16.mxu0 %v680_v6  ;;  %v639_v6 = vunpack.c.l.s8.bf16 %v255_v50 }
 0x147   :  { %1231 = vmatprep.subr.bf16.mxu1 %v346_v7  ;;  %v632_v7 = vunpack.c.h.s8.bf16 %v248_v3 }
 0x149   :  { %1162 = vmatpush2.bf16.msra.mxu0 %v679_v11  ;;  %v145_v11 = vld [vmem:[#allocation2 + $0x1f0] sm:$0xff] }
 0x14a   :  { %1232 = vmatpush1.bf16.msra.mxu1 %v345_v12  ;;  %1163 = vmatprep.subr.bf16.mxu0 %v672_v13  ;;  %v631_v13 = vunpack.c.h.s8.bf16 %v247_v9 }
 0x14b   :  { %1233 = vmatprep.subr.bf16.mxu1 %v338_v14  ;;  %v425_v14 = vunpack.c.h.s8.bf16 %v145_v11 }
 0x14d   :  { %1164 = vmatpush2.bf16.msra.mxu0 %v671_v18  ;;  %v138_v18 = vld [vmem:[#allocation2 + $0x1b8] sm:$0xff] }
 0x14e   :  { %1234 = vmatpush1.bf16.msra.mxu1 %v337_v19  ;;  %1165 = vmatprep.subr.bf16.mxu0 %v664_v21  ;;  %v178_v19 = vld [vmem:[#allocation2 + $0x2f8] sm:$0xff]  ;;  %v623_v21 = vunpack.c.l.s8.bf16 %v247_v9  ;;  %v410_v23 = vunpack.c.h.s8.bf16 %v138_v18 }
 0x14f   :  { %1235 = vmatprep.subr.bf16.mxu1 %v330_v22  ;;  %v417_v22 = vunpack.c.l.s8.bf16 %v145_v11  ;;  %v490_v53 = vunpack.c.h.s8.bf16 %v178_v19  ;;  %v482_v32 = vunpack.c.l.s8.bf16 %v178_v19  ;;  %v153_v11 = vld [vmem:[#allocation2 + $0x230] sm:$0xff]  ;;  %v210_v19 = vld [vmem:[#allocation2 + $0x3f8] sm:$0xff] }
 0x150   :  { %v851_v36 = vpop.f32.mrf.mxu0 }
 0x151   :  { %v852_v37 = vadd.f32 %v851_v36, %v1680_v28  ;;  %1166 = vmatpush2.bf16.msra.mxu0 %v663_v25  ;;  %v177_v25 = vld [vmem:[#allocation2 + $0x2f0] sm:$0xff] }
 0x152   :  { %1236 = vmatpush1.bf16.msra.mxu1 %v329_v27  ;;  %v853_v45 = vpop.f32.mrf.mxu0  ;;  %1167 = vmatprep.subr.bf16.mxu0 %v656_v30  ;;  %v409_v27 = vunpack.c.h.s8.bf16 %v137_v24  ;;  %v489_v30 = vunpack.c.h.s8.bf16 %v177_v25 }
 0x153   :  { %1237 = vmatprep.subr.bf16.mxu1 %v322_v31  ;;  %v893_v28 = vadd.f32 %v1684_v17, %v852_v37  ;;  %v854_v54 = vadd.f32 %v853_v45, %v1682_v38  ;;  %v640_v17 = vunpack.c.l.s8.bf16 %v256_v33  ;;  %v402_v31 = vunpack.c.l.s8.bf16 %v138_v18  ;;  %v130_v33 = vld [vmem:[#allocation2 + $0x178] sm:$0xff] }
 0x154   :  { %v855_v59 = vpop.f32.mrf.mxu0  ;;  %v401_v37 = vunpack.c.l.s8.bf16 %v137_v24  ;;  %v474_v45 = vunpack.c.h.s8.bf16 %v170_v34 }
 0x155   :  { %v1433_v51 = vmul.f32 %v1396_v40, %v893_v28  ;;  %v895_v60 = vadd.f32 %v1688_v20, %v854_v54  ;;  %1168 = vmatpush2.bf16.msra.mxu0 %v655_v43  ;;  %v305_v20 = vunpack.c.l.s8.bf16 %v89_v52  ;;  %v481_v40 = vunpack.c.l.s8.bf16 %v177_v25  ;;  %v162_v59 = vld [vmem:[#allocation2 + $0x278] sm:$0xff]  ;;  %v209_v25 = vld [vmem:[#allocation2 + $0x3f0] sm:$0xff] }
 0x156   :  { %1238 = vmatpush1.bf16.msra.mxu1 %v321_v44  ;;  %v856_v1 = vpop.f32.mrf.mxu0  ;;  %1169 = vmatprep.subr.bf16.mxu0 %v648_v47  ;;  %v394_v44 = vunpack.c.h.s8.bf16 %v130_v33  ;;  %v129_v47 = vld [vmem:[#allocation2 + $0x170] sm:$0xff]  ;;  %v450_v3 = vunpack.c.l.s8.bf16 %v162_v59 }
 0x157   :  { %1239 = vmatprep.subr.bf16.mxu1 %v314_v49  ;;  %v1434_v38 = vmul.f32 %v1400_v56, %v895_v60  ;;  %v1715_v41 = vadd.f32 %v1446_v57, %v1433_v51  ;;  %v169_v49 = vld [vmem:[#allocation2 + $0x2b0] sm:$0xff]  ;;  %v393_v52 = vunpack.c.h.s8.bf16 %v129_v47  ;;  %v386_v56 = vunpack.c.l.s8.bf16 %v130_v33  ;;  %v202_v33 = vld [vmem:[#allocation2 + $0x3b8] sm:$0xff] }
 0x158   :  { %v473_v28 = vunpack.c.h.s8.bf16 %v169_v49  ;;  %v466_v57 = vunpack.c.l.s8.bf16 %v170_v34  ;;  %v385_v51 = vunpack.c.l.s8.bf16 %v129_v47  ;;  %v465_v60 = vunpack.c.l.s8.bf16 %v169_v49  ;;  %v161_v1 = vld [vmem:[#allocation2 + $0x270] sm:$0xff]  ;;  %v226_v34 = vld [vmem:[#allocation2 + $0x478] sm:$0xff] }
 0x159   :  { %v1717_v46 = vadd.f32 %v1450_v58, %v1434_v38  ;;  %1170 = vmatpush2.bf16.msra.mxu0 %v647_v63  ;;  %v122_v58 = vld [vmem:[#allocation2 + $0x138] sm:$0xff]  ;;  %v201_v47 = vld [vmem:[#allocation2 + $0x3b0] sm:$0xff] }
 0x15a   :  { %1240 = vmatpush1.bf16.msra.mxu1 %v313_v0  ;;  %1171 = vmatprep.subr.bf16.mxu0 %v640_v17  ;;  %v378_v63 = vunpack.c.h.s8.bf16 %v122_v58  ;;  %v121_v0 = vld [vmem:[#allocation2 + $0x130] sm:$0xff]  ;;  %v370_v38 = vunpack.c.l.s8.bf16 %v122_v58  ;;  %v537_v49 = vunpack.c.h.s8.bf16 %v201_v47  ;;  %v529_v58 = vunpack.c.l.s8.bf16 %v201_v47 }
 0x15b   :  { %1241 = vmatprep.subr.bf16.mxu1 %v306_v2  ;;  %v1499_v12 = vcombine.low %v1715_v41, %v1717_v46  ;;  %v377_v17 = vunpack.c.h.s8.bf16 %v121_v0  ;;  %v457_v2 = vunpack.c.h.s8.bf16 %v161_v1 }
 0x15d   :  { %1172 = vmatpush2.bf16.msra.mxu0 %v639_v6  ;;  %v242_v6 = vld [vmem:[#allocation2 + $0x4f8] sm:$0xff] }
 0x15e   :  { %1242 = vmatpush1.bf16.msra.mxu1 %v305_v20  ;;  %1173 = vmatprep.subr.bf16.mxu0 %v632_v7  ;;  %v369_v20 = vunpack.c.l.s8.bf16 %v121_v0  ;;  %v449_v7 = vunpack.c.l.s8.bf16 %v161_v1  ;;  %v618_v9 = vunpack.c.h.s8.bf16 %v242_v6  ;;  %v610_v18 = vunpack.c.l.s8.bf16 %v242_v6  ;;  %v217_v0 = vld [vmem:[#allocation2 + $0x430] sm:$0xff]  ;;  %v186_v6 = vld [vmem:[#allocation2 + $0x338] sm:$0xff] }
 0x15f   :  { %1243 = vmatprep.subr.bf16.mxu1 %v426_v8  ;;  %v442_v8 = vunpack.c.h.s8.bf16 %v154_v4 }
 0x161   :  { %1174 = vmatpush2.bf16.msra.mxu0 %v631_v13  ;;  %v241_v13 = vld [vmem:[#allocation2 + $0x4f0] sm:$0xff] }
 0x162   :  { %1244 = vmatpush2.bf16.msra.mxu1 %v425_v14  ;;  %1175 = vmatprep.subr.bf16.mxu0 %v624_v15  ;;  %v441_v14 = vunpack.c.h.s8.bf16 %v153_v11  ;;  %v617_v15 = vunpack.c.h.s8.bf16 %v241_v13 }
 0x163   :  { %1245 = vmatprep.subr.bf16.mxu1 %v418_v16  ;;  %v434_v16 = vunpack.c.l.s8.bf16 %v154_v4 }
 0x165   :  { %1176 = vmatpush2.bf16.msra.mxu0 %v623_v21  ;;  %v234_v21 = vld [vmem:[#allocation2 + $0x4b8] sm:$0xff] }
 0x166   :  { %1246 = vmatpush2.bf16.msra.mxu1 %v417_v22  ;;  %1268 = vmatprep.subr.bf16.mxu0 %v490_v53  ;;  %v433_v22 = vunpack.c.l.s8.bf16 %v153_v11  ;;  %v554_v53 = vunpack.c.h.s8.bf16 %v210_v19  ;;  %v602_v24 = vunpack.c.h.s8.bf16 %v234_v21 }
 0x167   :  { %1247 = vmatprep.subr.bf16.mxu1 %v410_v23  ;;  %v609_v23 = vunpack.c.l.s8.bf16 %v241_v13  ;;  %v185_v13 = vld [vmem:[#allocation2 + $0x330] sm:$0xff] }
 0x168   :  { %1178 = vmatmul.mubr.bf16.vlgmr.msra.gmra.mxu0 %v1667_v48 }
 0x169   :  { %v1721_v36 = vpop.f32.mrf.mxu1  ;;  %1269 = vmatpush1.bf16.msra.mxu0 %v489_v30  ;;  %1300 = vmatprep.mubr.bf16.mxu0 %v1629_v55  ;;  %v458_v55 = vunpack.c.h.s8.bf16 %v162_v59  ;;  %v553_v30 = vunpack.c.h.s8.bf16 %v209_v25 }
 0x16a   :  { %1248 = vmatpush2.bf16.msra.mxu1 %v409_v27  ;;  %1270 = vmatprep.subr.bf16.mxu0 %v482_v32  ;;  %v233_v27 = vld [vmem:[#allocation2 + $0x4b0] sm:$0xff]  ;;  %v546_v32 = vunpack.c.l.s8.bf16 %v210_v19 }
 0x16b   :  { %v1724_v43 = vpop.f32.mrf.mxu1  ;;  %1249 = vmatprep.subr.bf16.mxu1 %v402_v31  ;;  %v601_v31 = vunpack.c.h.s8.bf16 %v233_v27 }
 0x16d   :  { %v937_v50 = vpop.f32.mrf.mxu1  ;;  %1271 = vmatpush1.bf16.msra.mxu0 %v481_v40  ;;  %v593_v40 = vunpack.c.l.s8.bf16 %v233_v27  ;;  %v265_v27 = vld [vmem:[#allocation2 + $0x5b0] sm:$0xff] }
 0x16e   :  { %1250 = vmatpush2.bf16.msra.mxu1 %v401_v37  ;;  %1272 = vmatprep.subr.bf16.mxu0 %v474_v45  ;;  %v545_v37 = vunpack.c.l.s8.bf16 %v209_v25  ;;  %v586_v45 = vunpack.c.h.s8.bf16 %v226_v34 }
 0x16f   :  { %v938_v54 = vpop.f32.mrf.mxu1  ;;  %1251 = vmatprep.subr.bf16.mxu1 %v394_v44  ;;  %v538_v44 = vunpack.c.h.s8.bf16 %v202_v33 }
 0x170   :  { %v194_v54 = vld [vmem:[#allocation2 + $0x378] sm:$0xff] }
 0x171   :  { %1273 = vmatpush1.bf16.msra.mxu0 %v473_v28  ;;  %v578_v28 = vunpack.c.l.s8.bf16 %v226_v34 }
 0x172   :  { %1252 = vmatpush2.bf16.msra.mxu1 %v393_v52  ;;  %1274 = vmatprep.subr.bf16.mxu0 %v466_v57  ;;  %v530_v52 = vunpack.c.l.s8.bf16 %v202_v33 }
 0x173   :  { %1253 = vmatprep.subr.bf16.mxu1 %v386_v56  ;;  %v218_v56 = vld [vmem:[#allocation2 + $0x438] sm:$0xff] }
 0x174   :  { %v562_v4 = vunpack.c.l.s8.bf16 %v218_v56 }
 0x175   :  { %1275 = vmatpush1.bf16.msra.mxu0 %v465_v60  ;;  %v522_v60 = vunpack.c.h.s8.bf16 %v194_v54 }
 0x176   :  { %1254 = vmatpush2.bf16.msra.mxu1 %v385_v51  ;;  %1276 = vmatprep.subr.bf16.mxu0 %v458_v55  ;;  %v193_v55 = vld [vmem:[#allocation2 + $0x370] sm:$0xff] }
 0x177   :  { %1255 = vmatprep.subr.bf16.mxu1 %v378_v63  ;;  %v570_v63 = vunpack.c.h.s8.bf16 %v218_v56 }
 0x179   :  { %1277 = vmatpush1.bf16.msra.mxu0 %v457_v2  ;;  %v569_v2 = vunpack.c.h.s8.bf16 %v217_v0 }
 0x17a   :  { %1256 = vmatpush2.bf16.msra.mxu1 %v377_v17  ;;  %1278 = vmatprep.subr.bf16.mxu0 %v450_v3  ;;  %v521_v17 = vunpack.c.h.s8.bf16 %v193_v55  ;;  %v514_v3 = vunpack.c.l.s8.bf16 %v194_v54 }
 0x17b   :  { %1257 = vmatprep.subr.bf16.mxu1 %v370_v38 }
 0x17d   :  { %1279 = vmatpush1.bf16.msra.mxu0 %v449_v7  ;;  %v513_v7 = vunpack.c.l.s8.bf16 %v193_v55 }
 0x17e   :  { %1258 = vmatpush2.bf16.msra.mxu1 %v369_v20  ;;  %1280 = vmatprep.subr.bf16.mxu0 %v442_v8  ;;  %v274_v20 = vld [vmem:[#allocation2 + $0x5f8] sm:$0xff]  ;;  %v561_v8 = vunpack.c.l.s8.bf16 %v217_v0 }
 0x17f   :  { %1309 = vmatprep.subr.bf16.mxu1 %v618_v9  ;;  %v506_v9 = vunpack.c.h.s8.bf16 %v186_v6  ;;  %v682_v11 = vunpack.c.h.s8.bf16 %v274_v20  ;;  %v674_v19 = vunpack.c.l.s8.bf16 %v274_v20 }
 0x181   :  { %1260 = vmatmul.mubr.bf16.vlgmr.msra.gmra.mxu1 %v1645_v61  ;;  %1281 = vmatpush1.bf16.msra.mxu0 %v441_v14  ;;  %v594_v61 = vunpack.c.l.s8.bf16 %v234_v21  ;;  %v273_v14 = vld [vmem:[#allocation2 + $0x5f0] sm:$0xff]  ;;  %v266_v21 = vld [vmem:[#allocation2 + $0x5b8] sm:$0xff] }
 0x182   :  { %1310 = vmatpush1.bf16.msra.mxu1 %v617_v15  ;;  %1282 = vmatprep.subr.bf16.mxu0 %v434_v16  ;;  %v505_v15 = vunpack.c.h.s8.bf16 %v185_v13  ;;  %v681_v16 = vunpack.c.h.s8.bf16 %v273_v14  ;;  %v658_v33 = vunpack.c.l.s8.bf16 %v266_v21 }
 0x183   :  { %1311 = vmatprep.subr.bf16.mxu1 %v610_v18  ;;  %1341 = vmatprep.mubr.bf16.mxu1 %v1651_v5  ;;  %v225_v5 = vld [vmem:[#allocation2 + $0x470] sm:$0xff]  ;;  %v498_v18 = vunpack.c.l.s8.bf16 %v186_v6 }
 0x184   :  { %v585_v50 = vunpack.c.h.s8.bf16 %v225_v5  ;;  %v577_v59 = vunpack.c.l.s8.bf16 %v225_v5 }
 0x185   :  { %1283 = vmatpush1.bf16.msra.mxu0 %v433_v22  ;;  %v298_v22 = vld [vmem:[#allocation2 + $0x6b8] sm:$0xff] }
 0x186   :  { %1312 = vmatpush1.bf16.msra.mxu1 %v609_v23  ;;  %1284 = vmatprep.subr.bf16.mxu0 %v554_v53  ;;  %v497_v23 = vunpack.c.l.s8.bf16 %v185_v13  ;;  %v673_v53 = vunpack.c.l.s8.bf16 %v273_v14  ;;  %v730_v25 = vunpack.c.h.s8.bf16 %v298_v22  ;;  %v722_v34 = vunpack.c.l.s8.bf16 %v298_v22 }
 0x187   :  { %1313 = vmatprep.subr.bf16.mxu1 %v602_v24  ;;  %v666_v24 = vunpack.c.h.s8.bf16 %v266_v21  ;;  %v281_v21 = vld [vmem:[#allocation2 + $0x630] sm:$0xff] }
 0x188   :  { %v689_v41 = vunpack.c.l.s8.bf16 %v281_v21 }
 0x189   :  { %1285 = vmatpush2.bf16.msra.mxu0 %v553_v30  ;;  %v297_v30 = vld [vmem:[#allocation2 + $0x6b0] sm:$0xff] }
 0x18a   :  { %1314 = vmatpush1.bf16.msra.mxu1 %v601_v31  ;;  %1286 = vmatprep.subr.bf16.mxu0 %v546_v32  ;;  %v1403_v31 = vsub.s32 2, %v1608_v26  ;;  %v665_v32 = vunpack.c.h.s8.bf16 %v265_v27  ;;  %v721_v54 = vunpack.c.l.s8.bf16 %v297_v30 }
 0x18b   :  { %1315 = vmatprep.subr.bf16.mxu1 %v594_v61  ;;  %v729_v61 = vunpack.c.h.s8.bf16 %v297_v30 }
 0x18d   :  { %1287 = vmatpush2.bf16.msra.mxu0 %v545_v37 }
 0x18e   :  { %1316 = vmatpush1.bf16.msra.mxu1 %v593_v40  ;;  %1288 = vmatprep.subr.bf16.mxu0 %v538_v44  ;;  %v1407_v40 = vsub.s32 3, %v1608_v26  ;;  %v258_v44 = vld [vmem:[#allocation2 + $0x578] sm:$0xff] }
 0x18f   :  { %1317 = vmatprep.subr.bf16.mxu1 %v586_v45  ;;  %v290_v45 = vld [vmem:[#allocation2 + $0x678] sm:$0xff]  ;;  %v642_v20 = vunpack.c.l.s8.bf16 %v258_v44 }
 0x190   :  { %v1729_v57 = vpop.f32.mrf.mxu0 }
 0x191   :  { %1289 = vmatpush2.bf16.msra.mxu0 %v537_v49  ;;  %v975_v37 = vadd.f32 %v1729_v57, %v1721_v36  ;;  %v1404_v49 = vrot.slane %v1699_v29, %v1403_v31  ;;  %v650_v57 = vunpack.c.h.s8.bf16 %v258_v44 }
 0x192   :  { %1318 = vmatpush1.bf16.msra.mxu1 %v585_v50  ;;  %v1731_v51 = vpop.f32.mrf.mxu0  ;;  %1290 = vmatprep.subr.bf16.mxu0 %v530_v52 }
 0x193   :  { %1319 = vmatprep.subr.bf16.mxu1 %v578_v28  ;;  %v977_v50 = vadd.f32 %v1731_v51, %v1724_v43  ;;  %v657_v28 = vunpack.c.l.s8.bf16 %v265_v27  ;;  %v1454_v43 = vrot.slane %v1707_v42, %v1403_v31  ;;  %v1458_v51 = vrot.slane %v1707_v42, %v1407_v40 }
 0x194   :  { %v978_v1 = vpop.f32.mrf.mxu0 }
 0x195   :  { %1291 = vmatpush2.bf16.msra.mxu0 %v529_v58  ;;  %v714_v58 = vunpack.c.h.s8.bf16 %v290_v45 }
 0x196   :  { %1320 = vmatpush1.bf16.msra.mxu1 %v577_v59  ;;  %v979_v38 = vpop.f32.mrf.mxu0  ;;  %1292 = vmatprep.subr.bf16.mxu0 %v522_v60  ;;  %v257_v59 = vld [vmem:[#allocation2 + $0x570] sm:$0xff] }
 0x197   :  { %1321 = vmatprep.subr.bf16.mxu1 %v570_v63  ;;  %v289_v60 = vld [vmem:[#allocation2 + $0x670] sm:$0xff]  ;;  %v649_v38 = vunpack.c.h.s8.bf16 %v257_v59  ;;  %v641_v14 = vunpack.c.l.s8.bf16 %v257_v59 }
 0x199   :  { %1293 = vmatpush2.bf16.msra.mxu0 %v521_v17 }
 0x19a   :  { %1322 = vmatpush1.bf16.msra.mxu1 %v569_v2  ;;  %1294 = vmatprep.subr.bf16.mxu0 %v514_v3  ;;  %v713_v3 = vunpack.c.h.s8.bf16 %v289_v60 }
 0x19b   :  { %1323 = vmatprep.subr.bf16.mxu1 %v562_v4 }
 0x19d   :  { %1295 = vmatpush2.bf16.msra.mxu0 %v513_v7  ;;  %v706_v7 = vunpack.c.l.s8.bf16 %v290_v45 }
 0x19e   :  { %1324 = vmatpush1.bf16.msra.mxu1 %v561_v8  ;;  %1296 = vmatprep.subr.bf16.mxu0 %v506_v9  ;;  %v282_v9 = vld [vmem:[#allocation2 + $0x638] sm:$0xff] }
 0x19f   :  { %1325 = vmatprep.subr.bf16.mxu1 %v682_v11  ;;  %v690_v30 = vunpack.c.l.s8.bf16 %v282_v9 }
 0x1a1   :  { %1297 = vmatpush2.bf16.msra.mxu0 %v505_v15  ;;  %v705_v15 = vunpack.c.l.s8.bf16 %v289_v60 }
 0x1a2   :  { %1326 = vmatpush2.bf16.msra.mxu1 %v681_v16  ;;  %1298 = vmatprep.subr.bf16.mxu0 %v498_v18  ;;  %v698_v18 = vunpack.c.h.s8.bf16 %v282_v9  ;;  %v1419_v9 = vsub.s32 6, %v1608_v26 }
 0x1a3   :  { %1327 = vmatprep.subr.bf16.mxu1 %v674_v19  ;;  %v249_v19 = vld [vmem:[#allocation2 + $0x530] sm:$0xff] }
 0x1a5   :  { %1299 = vmatpush2.bf16.msra.mxu0 %v497_v23  ;;  %v1507_v23 = vrot.slane %v1499_v12, %v1611_v35 }
 0x1a6   :  { %1328 = vmatpush2.bf16.msra.mxu1 %v673_v53  ;;  %1354 = vmatprep.subr.bf16.mxu0 %v730_v25  ;;  %v697_v25 = vunpack.c.h.s8.bf16 %v281_v21 }
 0x1a7   :  { %1329 = vmatprep.subr.bf16.mxu1 %v666_v24  ;;  %v633_v24 = vunpack.c.h.s8.bf16 %v249_v19 }
 0x1a8   :  { %v1056_v5 = vpop.f32.mrf.mxu0  ;;  %1301 = vmatmul.mubr.bf16.vlgmr.msra.gmra.mxu0 %v1649_v62  ;;  %v1408_v62 = vrot.slane %v1699_v29, %v1407_v40 }
 0x1a9   :  { %v1015_v47 = vpop.f32.mrf.mxu1  ;;  %1355 = vmatpush1.bf16.msra.mxu0 %v729_v61  ;;  %1382 = vmatprep.mubr.bf16.mxu0 %v1579_v10  ;;  %v250_v10 = vld [vmem:[#allocation2 + $0x538] sm:$0xff] }
 0x1aa   :  { %v1016_v52 = vadd.f32 %v1015_v47, %v975_v37  ;;  %1330 = vmatpush2.bf16.msra.mxu1 %v665_v32  ;;  %v1058_v36 = vpop.f32.mrf.mxu0  ;;  %1356 = vmatprep.subr.bf16.mxu0 %v722_v34  ;;  %v634_v16 = vunpack.c.h.s8.bf16 %v250_v10  ;;  %v626_v27 = vunpack.c.l.s8.bf16 %v250_v10  ;;  %v625_v32 = vunpack.c.l.s8.bf16 %v249_v19 }
 0x1ab   :  { %v1017_v56 = vpop.f32.mrf.mxu1  ;;  %1331 = vmatprep.subr.bf16.mxu1 %v658_v33  ;;  %v1420_v19 = vrot.slane %v1699_v29, %v1419_v9 }
 0x1ac   :  { %v1057_v63 = vadd.f32 %v1056_v5, %v1016_v52  ;;  %v1018_v55 = vadd.f32 %v1017_v56, %v977_v50  ;;  %v1060_v1 = vpop.f32.mrf.mxu0 }
 0x1ad   :  { %v1019_v0 = vpop.f32.mrf.mxu1  ;;  %1357 = vmatpush1.bf16.msra.mxu0 %v721_v54 }
 0x1ae   :  { %v1435_v17 = vmul.f32 %v1404_v49, %v1057_v63  ;;  %v1059_v2 = vadd.f32 %v1058_v36, %v1018_v55  ;;  %1332 = vmatpush2.bf16.msra.mxu1 %v657_v28  ;;  %v1061_v6 = vpop.f32.mrf.mxu0  ;;  %1358 = vmatprep.subr.bf16.mxu0 %v714_v58  ;;  %v1411_v28 = vsub.s32 4, %v1608_v26 }
 0x1af   :  { %v1020_v4 = vpop.f32.mrf.mxu1  ;;  %1333 = vmatprep.subr.bf16.mxu1 %v650_v57 }
 0x1b0   :  { %v1436_v8 = vmul.f32 %v1408_v62, %v1059_v2  ;;  %v1485_v11 = vadd.f32 %v1454_v43, %v1435_v17  ;;  %v1412_v56 = vrot.slane %v1699_v29, %v1411_v28  ;;  %v1462_v55 = vrot.slane %v1707_v42, %v1411_v28 }
 0x1b1   :  { %1359 = vmatpush1.bf16.msra.mxu0 %v713_v3 }
 0x1b2   :  { %v1486_v13 = vadd.f32 %v1458_v51, %v1436_v8  ;;  %1334 = vmatpush2.bf16.msra.mxu1 %v649_v38  ;;  %1360 = vmatprep.subr.bf16.mxu0 %v706_v7 }
 0x1b3   :  { %1335 = vmatprep.subr.bf16.mxu1 %v642_v20 }
 0x1b4   :  { %v1500_v22 = vcombine.low %v1485_v11, %v1486_v13  ;;  %v1423_v13 = vsub.s32 7, %v1608_v26 }
 0x1b5   :  { %1361 = vmatpush1.bf16.msra.mxu0 %v705_v15 }
 0x1b6   :  { %v1514_v53 = vrot.slane %v1500_v22, %v1611_v35  ;;  %1336 = vmatpush2.bf16.msra.mxu1 %v641_v14  ;;  %1362 = vmatprep.subr.bf16.mxu0 %v698_v18 }
 0x1b7   :  { %1337 = vmatprep.subr.bf16.mxu1 %v634_v16 }
 0x1b8   :  { %v1515_v31 = vcombine.low %v1507_v23, %v1514_v53 }
 0x1b9   :  { %1363 = vmatpush1.bf16.msra.mxu0 %v697_v25 }
 0x1ba   :  { %1535 = vst [vmem:[%s1777_s4] sm:$0xff] %v1515_v31  ;;  %1338 = vmatpush2.bf16.msra.mxu1 %v633_v24  ;;  %1364 = vmatprep.subr.bf16.mxu0 %v690_v30  ;;  %v1424_v24 = vrot.slane %v1699_v29, %v1423_v13  ;;  %v1470_v31 = vrot.slane %v1707_v42, %v1419_v9 }
 0x1bb   :  { %1339 = vmatprep.subr.bf16.mxu1 %v626_v27 }
 0x1bd   :  { %1365 = vmatpush1.bf16.msra.mxu0 %v689_v41 }
 0x1be   :  { %1340 = vmatpush2.bf16.msra.mxu1 %v625_v32 }
 0x1c0   :  { %1545 = vmatmul.mubr.msk.bf16.vlgmr.msra.gmra.mxu0 %vm731_vm0, %v1660_v39 }
 0x1c1   :  { %1342 = vmatmul.mubr.bf16.vlgmr.msra.gmra.mxu1 %v1667_v48  ;;  %v1415_v48 = vsub.s32 5, %v1608_v26  ;;  %v1474_v26 = vrot.slane %v1707_v42, %v1423_v13 }
 0x1c3   :  { %v1416_v59 = vrot.slane %v1699_v29, %v1415_v48  ;;  %v1466_v43 = vrot.slane %v1707_v42, %v1415_v48 }
 0x1e8   :  { %v1097_v46 = vpop.f32.mrf.mxu0 }
 0x1e9   :  { %v1138_v12 = vpop.f32.mrf.mxu1 }
 0x1ea   :  { %v1139_v61 = vadd.f32 %v1138_v12, %v1097_v46  ;;  %v1099_v33 = vpop.f32.mrf.mxu0 }
 0x1eb   :  { %v1140_v34 = vpop.f32.mrf.mxu1 }
 0x1ec   :  { %v1141_v37 = vadd.f32 %v1140_v34, %v1099_v33  ;;  %v1101_v40 = vpop.f32.mrf.mxu0 }
 0x1ed   :  { %v1142_v44 = vpop.f32.mrf.mxu1 }
 0x1ee   :  { %v1102_v45 = vpop.f32.mrf.mxu0 }
 0x1ef   :  { %v1143_v47 = vpop.f32.mrf.mxu1 }
 0x201   :  { %v1220_v5 = vpop.f32.mrf.mxu1 }
 0x203   :  { %v1222_v49 = vpop.f32.mrf.mxu1 }
 0x205   :  { %v1224_v50 = vpop.f32.mrf.mxu1 }
 0x207   :  { %v1225_v52 = vpop.f32.mrf.mxu1 }
 0x228   :  { %v1179_v54 = vpop.f32.mrf.mxu0 }
 0x229   :  { %v1180_v39 = vadd.f32 %v1179_v54, %v1139_v61 }
 0x22a   :  { %v1181_v36 = vpop.f32.mrf.mxu0 }
 0x22b   :  { %v1221_v57 = vadd.f32 %v1220_v5, %v1180_v39  ;;  %v1182_v58 = vadd.f32 %v1181_v36, %v1141_v37 }
 0x22c   :  { %v1183_v60 = vpop.f32.mrf.mxu0 }
 0x22d   :  { %v1437_v63 = vmul.f32 %v1412_v56, %v1221_v57  ;;  %v1223_v62 = vadd.f32 %v1222_v49, %v1182_v58 }
 0x22e   :  { %v1184_v51 = vpop.f32.mrf.mxu0 }
 0x22f   :  { %v1438_v0 = vmul.f32 %v1416_v59, %v1223_v62  ;;  %v1487_v1 = vadd.f32 %v1462_v55, %v1437_v63 }
 0x231   :  { %v1488_v17 = vadd.f32 %v1466_v43, %v1438_v0 }
 0x233   :  { %v1516_v2 = vcombine.low %v1487_v1, %v1488_v17 }
 0x235   :  { %v1524_v37 = vrot.slane %v1516_v2, %v1611_v35 }
 0x241   :  { %v1261_v38 = vpop.f32.mrf.mxu1 }
 0x243   :  { %v1263_v3 = vpop.f32.mrf.mxu1 }
 0x245   :  { %v1265_v4 = vpop.f32.mrf.mxu1 }
 0x247   :  { %v1266_v6 = vpop.f32.mrf.mxu1 }
 0x268   :  { %v1302_v20 = vpop.f32.mrf.mxu0 }
 0x269   :  { %v1303_v11 = vadd.f32 %v1302_v20, %v1261_v38 }
 0x26a   :  { %v1304_v7 = vpop.f32.mrf.mxu0 }
 0x26b   :  { %v1305_v16 = vadd.f32 %v1304_v7, %v1263_v3 }
 0x26c   :  { %v1306_v8 = vpop.f32.mrf.mxu0 }
 0x26e   :  { %v1307_v10 = vpop.f32.mrf.mxu0 }
 0x280   :  { %v1384_v15 = vpop.f32.mrf.mxu0 }
 0x281   :  { %v1343_v14 = vpop.f32.mrf.mxu1 }
 0x282   :  { %v1344_v18 = vadd.f32 %v1343_v14, %v1303_v11  ;;  %v1386_v22 = vpop.f32.mrf.mxu0 }
 0x283   :  { %v1345_v21 = vpop.f32.mrf.mxu1 }
 0x284   :  { %v1385_v23 = vadd.f32 %v1384_v15, %v1344_v18  ;;  %v1346_v53 = vadd.f32 %v1345_v21, %v1305_v16  ;;  %v1388_v27 = vpop.f32.mrf.mxu0 }
 0x285   :  { %v1347_v25 = vpop.f32.mrf.mxu1 }
 0x286   :  { %v1439_v30 = vmul.f32 %v1420_v19, %v1385_v23  ;;  %v1387_v32 = vadd.f32 %v1386_v22, %v1346_v53  ;;  %v1389_v46 = vpop.f32.mrf.mxu0 }
 0x287   :  { %v1348_v41 = vpop.f32.mrf.mxu1 }
 0x288   :  { %v1440_v12 = vmul.f32 %v1424_v24, %v1387_v32  ;;  %v1489_v61 = vadd.f32 %v1470_v31, %v1439_v30 }
 0x28a   :  { %v1490_v33 = vadd.f32 %v1474_v26, %v1440_v12 }
 0x28c   :  { %v1517_v34 = vcombine.low %v1489_v61, %v1490_v33 }
 0x28e   :  { %v1531_v40 = vrot.slane %v1517_v34, %v1611_v35 }
 0x290   :  { %v1532_v44 = vcombine.low %v1524_v37, %v1531_v40 }
 0x292   :  { %1536 = vst [vmem:[%s1777_s4 + $0x8] sm:$0xff] %v1532_v44 }
 0x293   :  { %1541 = vsyncpa [#allocation3], 1 }

</bundles_post_ra>
